<compile_context>
chip_gen: v5e
topology: v5e:2x2
jax: 0.10.0
libtpu: 0.0.40
codegen_flags: <defaults>
</compile_context>

<pallas_src>
import functools

import jax
import jax.numpy as jnp
from jax.experimental import pallas as pl
from jax.experimental.pallas import tpu as pltpu


def _descriptor_yolo_v4_kernel(t_ref, scale_ref, off_ref, w_ref, b_ref,
                               out_ref, *, class_count):
    # t_ref:     (nb, Ab, 5+D, HW)   raw head output (lane-dense HW)
    # scale_ref: (Ab, 5, HW)         per-sublane multiplier [sxy*s, sxy*s, aw*s, ah*s, 1]
    # off_ref:   (Ab, 5, HW)         per-sublane additive term (fused grid offsets)
    # w_ref:     (C, D)              classifier conv weight
    # b_ref:     (C, 1)              classifier conv bias
    # out_ref:   (nb, Ab, 5+C+D, HW) [x, y, w, h, conf, class_scores, norm_desc]
    nb, A, P, HW = t_ref.shape
    C = class_count
    D = P - 5
    f32 = jnp.float32

    # --- box / confidence head: one 5-channel load, fused sigmoid / clamped
    #     exp slab, per-sublane select + affine table (constants folded at
    #     __init__).  The extra sigmoid/exp work rides in the EUP slot.
    t05 = t_ref[:, :, 0:5, :].astype(f32)                        # (nb, A, 5, HW)
    sig = jax.nn.sigmoid(t05)
    ex = jnp.minimum(jnp.exp(t05), 1000.0)
    ch = jax.lax.broadcasted_iota(jnp.int32, (1, 1, 5, HW), 2)
    is_wh = jnp.logical_and(ch >= 2, ch < 4)
    head = (jnp.where(is_wh, ex, sig) * scale_ref[...].astype(f32)[None]
            + off_ref[...].astype(f32)[None])                    # (nb, A, 5, HW)

    # --- descriptors: L2-normalize over D (sublane reduce + single rsqrt)
    d = t_ref[:, :, 5:, :].astype(f32)                           # (nb, A, D, HW)
    sumsq = jnp.sum(d * d, axis=2, keepdims=True)                # (nb, A, 1, HW)
    dn = d * jax.lax.rsqrt(jnp.maximum(sumsq, 1e-24))            # == d / max(||d||, 1e-12)

    # --- class scores: Conv2d(1, C, (1, D)) == (C, D) @ (D, HW) per (n, a),
    #     done as ONE batched dot_general (no Python-unrolled tiny matmuls).
    w = w_ref[...].astype(f32)                                   # (C, D)
    b = b_ref[...].astype(f32)                                   # (C, 1)
    dn_flat = dn.reshape(nb * A, D, HW)
    w_b = jnp.broadcast_to(w[None], (nb * A, C, D))
    cs = jax.lax.dot_general(
        w_b, dn_flat,
        dimension_numbers=(((2,), (1,)), ((0,), (0,))),
        preferred_element_type=f32)                              # (nb*A, C, HW)
    cs = cs.reshape(nb, A, C, HW) + b[None, None, :, :]

    # --- single aligned full-tile store (no masked vst at sublane offsets)
    out_ref[...] = jnp.concatenate([head, cs, dn], axis=2).astype(out_ref.dtype)


class DescriptorYoloV4LayerPallas:
    def __init__(self, image_size, stride, anchors, class_count,
                 descriptor_size, scale_x_y, *, key=None):
        # Same conventions as the PyTorch module (whose x/y offset broadcast
        # implicitly requires a square grid).
        self._grid_size = (image_size[1] // stride, image_size[0] // stride)
        assert self._grid_size[0] == self._grid_size[1], "square grid required"
        self._stride = float(stride)
        # floor-division by the stride, exactly like the PyTorch module
        self._anchors = [(float(a[0] // stride), float(a[1] // stride))
                         for a in anchors]
        self._class_count = class_count
        self._descriptor_size = descriptor_size
        self._scale_x_y = float(scale_x_y)

        H = self._grid_size[1]
        W = self._grid_size[0]
        A = len(anchors)
        HW = H * W
        HW_pad = max(128, ((HW + 127) // 128) * 128)   # keep lanes unmasked
        self._hw = HW
        self._hw_pad = HW_pad

        gy = jnp.arange(H, dtype=jnp.float32)
        gx = jnp.arange(W, dtype=jnp.float32)
        # matches torch.meshgrid(y, x, indexing='ij') on a square grid
        self._y_offset, self._x_offset = jnp.meshgrid(gy, gx, indexing='ij')
        x_flat = self._x_offset.reshape(-1)
        y_flat = self._y_offset.reshape(-1)

        s = self._stride
        sxy = self._scale_x_y
        anc = jnp.asarray(self._anchors, jnp.float32)            # (A, 2), already //stride

        # per-(anchor, channel) multiplier: [sxy*s, sxy*s, anc_w*s, anc_h*s, 1]
        scale = jnp.stack([
            jnp.full((A,), sxy * s, jnp.float32),
            jnp.full((A,), sxy * s, jnp.float32),
            anc[:, 0] * s,
            anc[:, 1] * s,
            jnp.ones((A,), jnp.float32),
        ], axis=1)                                               # (A, 5)
        self._scale_tab = jnp.broadcast_to(
            scale[:, :, None], (A, 5, HW_pad)).astype(jnp.float32)

        # per-(anchor, channel) additive term: fused grid offsets for x/y
        off = jnp.zeros((A, 5, HW), jnp.float32)
        off = off.at[:, 0, :].set(((x_flat - 0.5 * (sxy - 1.0)) * s)[None, :])
        off = off.at[:, 1, :].set(((y_flat - 0.5 * (sxy - 1.0)) * s)[None, :])
        if HW_pad != HW:
            off = jnp.pad(off, ((0, 0), (0, 0), (0, HW_pad - HW)))
        self._off_tab = off

        # classifier parameters (mirror of nn.Conv2d(1, class_count, (1, D)))
        if key is None:
            key = jax.random.PRNGKey(42)
        kw, kb = jax.random.split(key)
        bound = 1.0 / float(descriptor_size) ** 0.5
        self._cls_weight = jax.random.uniform(
            kw, (class_count, descriptor_size), jnp.float32, -bound, bound)
        self._cls_bias = jax.random.uniform(
            kb, (class_count, 1), jnp.float32, -bound, bound)

    @staticmethod
    def _num_tensorcores_per_chip():
        # v7x has 2 TensorCores per chip; v5e/v6e have 1.
        try:
            kind = (jax.devices()[0].device_kind or "").lower()
            if "v7" in kind:
                return 2
        except Exception:
            pass
        return 1

    @staticmethod
    def _pick_images_per_step(n_images, io_bytes, temp_bytes, n_tensorcores):
        # Target 2-4 MiB of HBM traffic per grid step (amortize ~0.35 us/step
        # overhead) and keep double-buffered I/O blocks + f32 temporaries
        # under ~10 MiB of scoped VMEM.
        nb = max(1, (4 * 1024 * 1024) // max(1, io_bytes))
        per_image = 2 * io_bytes + temp_bytes
        nb = min(nb, max(1, (10 * 1024 * 1024) // max(1, per_image)))
        # Only force >= 2 grid steps on multi-TensorCore chips; on single-TC
        # v5e/v6e the grid is a sequential loop and bigger blocks are better.
        if n_tensorcores >= 2 and n_images >= 2:
            nb = min(nb, max(1, n_images // n_tensorcores))
        nb = max(1, min(nb, n_images))
        while n_images % nb != 0:          # avoid ragged edge blocks
            nb -= 1
        return nb

    def __call__(self, t, *, native_layout=False):
        N = t.shape[0]
        A = len(self._anchors)
        H = self._grid_size[1]
        W = self._grid_size[0]
        D = self._descriptor_size
        C = self._class_count
        P = 5 + D
        P_out = 5 + C + D
        HW = self._hw
        HW_pad = self._hw_pad
        assert t.shape == (N, A * P, H, W), t.shape

        # metadata-only reshape: NCHW -> (N, A, P, H*W); HW is lane-dense
        t4 = t.reshape(N, A, P, HW)
        if HW_pad != HW:
            t4 = jnp.pad(t4, ((0, 0), (0, 0), (0, 0), (0, HW_pad - HW)))

        n_tc = self._num_tensorcores_per_chip()
        # On dual-TC chips add a parallel grid axis over anchors so both cores
        # are fed even when N == 1; on single-TC chips keep anchors in-block.
        split_anchors = (n_tc >= 2) and (A >= 2)
        a_block = 1 if split_anchors else A
        a_steps = A // a_block

        itemsize = jnp.dtype(t4.dtype).itemsize
        in_bytes = a_block * P * HW_pad * itemsize
        out_bytes = a_block * P_out * HW_pad * itemsize
        temp_bytes = a_block * (4 * P + P_out) * HW_pad * 4      # f32 temporaries
        nb = self._pick_images_per_step(N, in_bytes + out_bytes, temp_bytes,
                                        1 if split_anchors else n_tc)
        grid = (N // nb, a_steps)

        kernel = functools.partial(_descriptor_yolo_v4_kernel, class_count=C)

        cost = pl.CostEstimate(
            flops=N * A * HW_pad * (2 * C * D + 3 * D + 16),
            transcendentals=N * A * HW_pad * 11,   # 5 sigmoid + 5 exp + 1 rsqrt
            bytes_accessed=N * A * (P + P_out) * HW_pad * itemsize,
        )

        out = pl.pallas_call(
            kernel,
            out_shape=jax.ShapeDtypeStruct((N, A, P_out, HW_pad), t.dtype),
            grid_spec=pltpu.PrefetchScalarGridSpec(
                num_scalar_prefetch=0,
                grid=grid,
                in_specs=[
                    pl.BlockSpec((nb, a_block, P, HW_pad),
                                 lambda i, a: (i, a, 0, 0)),
                    pl.BlockSpec((a_block, 5, HW_pad), lambda i, a: (a, 0, 0)),
                    pl.BlockSpec((a_block, 5, HW_pad), lambda i, a: (a, 0, 0)),
                    pl.BlockSpec((C, D), lambda i, a: (0, 0)),
                    pl.BlockSpec((C, 1), lambda i, a: (0, 0)),
                ],
                out_specs=pl.BlockSpec((nb, a_block, P_out, HW_pad),
                                       lambda i, a: (i, a, 0, 0)),
            ),
            compiler_params=pltpu.CompilerParams(
                dimension_semantics=("parallel", "parallel"),
                vmem_limit_bytes=32 * 1024 * 1024),
            cost_estimate=cost,
        )(t4, self._scale_tab, self._off_tab, self._cls_weight, self._cls_bias)

        if HW_pad != HW:
            out = out[..., :HW]
        if native_layout:
            return out                                  # (N, A, 5+C+D, H*W)
        # Consumer-side glue only: permute to the PyTorch layout
        # (N, H, W, A, 5+C+D).  This is a full extra HBM pass; pass
        # native_layout=True to skip it if the consumer accepts the kernel layout.
        return self.to_pytorch_layout(out, H, W)

    @staticmethod
    def to_pytorch_layout(out_native, H, W):
        N, A, P_out, _ = out_native.shape
        out = out_native.reshape(N, A, P_out, H, W)
        return jnp.transpose(out, (0, 3, 4, 1, 2))


def _reference_forward(layer, t):
    """Pure-JAX mirror of the PyTorch forward, for verification."""
    N, _, H, W = t.shape
    A = len(layer._anchors)
    D = layer._descriptor_size
    P = 5 + D
    s = layer._stride
    sxy = layer._scale_x_y
    # (N, A*P, H, W) -> (N, H, W, A, P) -> (N, A, H, W, P)
    t5 = jnp.transpose(t, (0, 2, 3, 1)).reshape(N, H, W, A, P)
    t5 = jnp.transpose(t5, (0, 3, 1, 2, 4)).astype(jnp.float32)
    x = (jax.nn.sigmoid(t5[..., 0]) * sxy - 0.5 * (sxy - 1.0)
         + layer._x_offset) * s
    y = (jax.nn.sigmoid(t5[..., 1]) * sxy - 0.5 * (sxy - 1.0)
         + layer._y_offset) * s
    x = jnp.transpose(x, (0, 2, 3, 1))[..., None]                 # (N,H,W,A,1)
    y = jnp.transpose(y, (0, 2, 3, 1))[..., None]
    t6 = jnp.transpose(t5, (0, 2, 3, 1, 4))                       # (N,H,W,A,P)
    anc = jnp.asarray(layer._anchors, jnp.float32)                # already //stride
    w = (jnp.minimum(jnp.exp(t6[..., 2]), 1000.0) * anc[:, 0] * s)[..., None]
    h = (jnp.minimum(jnp.exp(t6[..., 3]), 1000.0) * anc[:, 1] * s)[..., None]
    conf = jax.nn.sigmoid(t6[..., 4:5])
    desc = t6[..., 5:]
    norm = jnp.sqrt(jnp.sum(desc * desc, axis=-1, keepdims=True))
    dn = desc / jnp.maximum(norm, 1e-12)                          # F.normalize
    cs = jnp.einsum('nhwad,cd->nhwac', dn, layer._cls_weight) \
        + layer._cls_bias[:, 0]
    return jnp.concatenate([x, y, w, h, conf, cs, dn], axis=-1)


if __name__ == "__main__":
    image_size = (128, 128)
    stride = 8
    anchors = [(12.0, 16.0), (19.0, 36.0), (40.0, 28.0)]
    class_count = 8
    descriptor_size = 16
    scale_x_y = 1.05

    layer = DescriptorYoloV4LayerPallas(
        image_size, stride, anchors, class_count, descriptor_size, scale_x_y,
        key=jax.random.PRNGKey(7))

    N = 2
    A = len(anchors)
    P = 5 + descriptor_size
    P_out = 5 + class_count + descriptor_size
    H = image_size[1] // stride
    W = image_size[0] // stride

    t = jax.random.normal(jax.random.PRNGKey(0), (N, A * P, H, W),
                          dtype=jnp.float32)

    # Fast path: kernel-native layout, no extra HBM transpose pass.
    out_native = layer(t, native_layout=True)
    jax.block_until_ready(out_native)
    assert out_native.shape == (N, A, P_out, H * W), out_native.shape

    # PyTorch-layout path (exact semantics of the original module's forward).
    out_torch = layer(t)
    jax.block_until_ready(out_torch)
    assert out_torch.shape == (N, H, W, A, P_out), out_torch.shape

    ref = _reference_forward(layer, t)                            # (N,H,W,A,P_out)
    ref_native = jnp.transpose(ref, (0, 3, 4, 1, 2)).reshape(N, A, P_out, H * W)

    err_torch = float(jnp.max(jnp.abs(out_torch - ref)))
    err_native = float(jnp.max(jnp.abs(out_native - ref_native)))
    assert jnp.allclose(out_torch, ref, rtol=2e-3, atol=2e-3), err_torch
    assert jnp.allclose(out_native, ref_native, rtol=2e-3, atol=2e-3), err_native

    print("KERNEL_OK")
</pallas_src>

<mosaic_0001>
module attributes {stable_mosaic.version = 11 : i64} {
  func.func @_descriptor_yolo_v4_kernel(%arg0: i32, %arg1: i32, %arg2: memref<2x3x21x256xf32, #tpu.memory_space<vmem>>, %arg3: memref<3x5x256xf32, #tpu.memory_space<vmem>>, %arg4: memref<3x5x256xf32, #tpu.memory_space<vmem>>, %arg5: memref<8x16xf32, #tpu.memory_space<vmem>>, %arg6: memref<8x1xf32, #tpu.memory_space<vmem>>, %arg7: memref<2x3x29x256xf32, #tpu.memory_space<vmem>>) attributes {dimension_semantics = [#tpu.dimension_semantics<parallel>, #tpu.dimension_semantics<parallel>], iteration_bounds = array<i64: 1, 1>, scalar_prefetch = 0 : i64, scratch_operands = 0 : i64, tpu.core_type = #tpu.core_type<tc>, window_params = [{transform_indices = @transform_0, window_bounds = array<i64: 2, 3, 21, 256>}, {transform_indices = @transform_1, window_bounds = array<i64: 3, 5, 256>}, {transform_indices = @transform_2, window_bounds = array<i64: 3, 5, 256>}, {pipeline_mode = #tpu.pipeline_mode<synchronous>, transform_indices = @transform_3, window_bounds = array<i64: 8, 16>}, {pipeline_mode = #tpu.pipeline_mode<synchronous>, transform_indices = @transform_4, window_bounds = array<i64: 8, 1>}, {transform_indices = @transform_5, window_bounds = array<i64: 2, 3, 29, 256>}]} {
    %c0 = arith.constant 0 : index
    %c0_0 = arith.constant 0 : index
    %c0_1 = arith.constant 0 : index
    %c0_2 = arith.constant 0 : index
    %0 = vector.load %arg2[%c0, %c0_0, %c0_1, %c0_2] : memref<2x3x21x256xf32, #tpu.memory_space<vmem>>, vector<2x3x5x256xf32>
    %1 = arith.negf %0 : vector<2x3x5x256xf32>
    %2 = math.exp %1 : vector<2x3x5x256xf32>
    %cst = arith.constant 1.000000e+00 : f32
    %3 = vector.broadcast %cst : f32 to vector<2x3x5x256xf32>
    %4 = arith.addf %3, %2 : vector<2x3x5x256xf32>
    %5 = arith.divf %3, %4 : vector<2x3x5x256xf32>
    %6 = math.exp %0 : vector<2x3x5x256xf32>
    %cst_3 = arith.constant 1.000000e+03 : f32
    %7 = vector.broadcast %cst_3 : f32 to vector<2x3x5x256xf32>
    %8 = arith.minimumf %6, %7 : vector<2x3x5x256xf32>
    %9 = tpu.iota {dimensions = array<i32: 2>} : vector<1x1x5x256xi32>
    %c2_i32 = arith.constant 2 : i32
    %10 = vector.broadcast %c2_i32 : i32 to vector<1x1x5x256xi32>
    %11 = arith.cmpi sge, %9, %10 : vector<1x1x5x256xi32>
    %c4_i32 = arith.constant 4 : i32
    %12 = vector.broadcast %c4_i32 : i32 to vector<1x1x5x256xi32>
    %13 = arith.cmpi slt, %9, %12 : vector<1x1x5x256xi32>
    %14 = arith.andi %11, %13 : vector<1x1x5x256xi1>
    %15 = vector.shape_cast %14 : vector<1x1x5x256xi1> to vector<1x1x5x256xi1>
    %16 = vector.broadcast %15 : vector<1x1x5x256xi1> to vector<2x3x5x256xi1>
    %17 = arith.select %16, %8, %5 : vector<2x3x5x256xi1>, vector<2x3x5x256xf32>
    %c0_4 = arith.constant 0 : index
    %c0_5 = arith.constant 0 : index
    %c0_6 = arith.constant 0 : index
    %18 = vector.load %arg3[%c0_4, %c0_5, %c0_6] : memref<3x5x256xf32, #tpu.memory_space<vmem>>, vector<3x5x256xf32>
    %19 = vector.shape_cast %18 : vector<3x5x256xf32> to vector<1x3x5x256xf32>
    %20 = vector.broadcast %19 : vector<1x3x5x256xf32> to vector<2x3x5x256xf32>
    %21 = arith.mulf %17, %20 : vector<2x3x5x256xf32>
    %c0_7 = arith.constant 0 : index
    %c0_8 = arith.constant 0 : index
    %c0_9 = arith.constant 0 : index
    %22 = vector.load %arg4[%c0_7, %c0_8, %c0_9] : memref<3x5x256xf32, #tpu.memory_space<vmem>>, vector<3x5x256xf32>
    %23 = vector.shape_cast %22 : vector<3x5x256xf32> to vector<1x3x5x256xf32>
    %24 = vector.broadcast %23 : vector<1x3x5x256xf32> to vector<2x3x5x256xf32>
    %25 = arith.addf %21, %24 : vector<2x3x5x256xf32>
    %c0_10 = arith.constant 0 : index
    %c0_11 = arith.constant 0 : index
    %c5 = arith.constant 5 : index
    %c0_12 = arith.constant 0 : index
    %26 = vector.load %arg2[%c0_10, %c0_11, %c5, %c0_12] : memref<2x3x21x256xf32, #tpu.memory_space<vmem>>, vector<2x3x16x256xf32>
    %27 = arith.mulf %26, %26 : vector<2x3x16x256xf32>
    %cst_13 = arith.constant dense<0.000000e+00> : vector<2x3x256xf32>
    %28 = vector.multi_reduction <add>, %27, %cst_13 [2] : vector<2x3x16x256xf32> to vector<2x3x256xf32>
    %29 = vector.shape_cast %28 : vector<2x3x256xf32> to vector<2x3x1x256xf32>
    %cst_14 = arith.constant 1.000000e-24 : f32
    %30 = vector.broadcast %cst_14 : f32 to vector<2x3x1x256xf32>
    %31 = arith.maximumf %29, %30 : vector<2x3x1x256xf32>
    %32 = math.rsqrt %31 : vector<2x3x1x256xf32>
    %33 = vector.broadcast %32 : vector<2x3x1x256xf32> to vector<2x3x16x256xf32>
    %34 = arith.mulf %26, %33 : vector<2x3x16x256xf32>
    %c0_15 = arith.constant 0 : index
    %c0_16 = arith.constant 0 : index
    %35 = vector.load %arg5[%c0_15, %c0_16] : memref<8x16xf32, #tpu.memory_space<vmem>>, vector<8x16xf32>
    %c0_17 = arith.constant 0 : index
    %c0_18 = arith.constant 0 : index
    %36 = vector.load %arg6[%c0_17, %c0_18] : memref<8x1xf32, #tpu.memory_space<vmem>>, vector<8x1xf32>
    %37 = vector.shape_cast %34 : vector<2x3x16x256xf32> to vector<6x16x256xf32>
    %38 = vector.shape_cast %35 : vector<8x16xf32> to vector<1x8x16xf32>
    %39 = vector.shape_cast %38 : vector<1x8x16xf32> to vector<1x8x16xf32>
    %40 = vector.broadcast %39 : vector<1x8x16xf32> to vector<6x8x16xf32>
    %cst_19 = arith.constant dense<0.000000e+00> : vector<6x8x256xf32>
    %41 = tpu.matmul %40, %37, %cst_19 {dimension_numbers = #tpu.dot_dimension_numbers<[2], [1], [1], [2], [0, 0, 0, 1, 1, 2], [0], [0]>} : vector<6x8x16xf32>, vector<6x16x256xf32>, vector<6x8x256xf32> -> vector<6x8x256xf32>
    %42 = vector.shape_cast %41 : vector<6x8x256xf32> to vector<2x3x8x256xf32>
    %43 = vector.shape_cast %36 : vector<8x1xf32> to vector<1x1x8x1xf32>
    %44 = vector.broadcast %43 : vector<1x1x8x1xf32> to vector<2x3x8x256xf32>
    %45 = arith.addf %42, %44 : vector<2x3x8x256xf32>
    %46 = tpu.concatenate %25, %45, %34 in 2 : vector<2x3x5x256xf32>, vector<2x3x8x256xf32>, vector<2x3x16x256xf32> -> vector<2x3x29x256xf32>
    %c0_20 = arith.constant 0 : index
    %c0_21 = arith.constant 0 : index
    %c0_22 = arith.constant 0 : index
    %c0_23 = arith.constant 0 : index
    %47 = vector.load %arg7[%c0_20, %c0_21, %c0_22, %c0_23] : memref<2x3x29x256xf32, #tpu.memory_space<vmem>>, vector<2x3x29x256xf32>
    tpu.vector_store %arg7[%c0_20, %c0_21, %c0_22, %c0_23], %46 {strides = array<i32>} : memref<2x3x29x256xf32, #tpu.memory_space<vmem>>, vector<2x3x29x256xf32>,
    return
  }
  func.func @transform_0(%arg0: i32, %arg1: i32) -> (i32, i32, i32, i32) {
    %c0_i32 = arith.constant 0 : i32
    %c0_i32_0 = arith.constant 0 : i32
    %c0_i32_1 = arith.constant 0 : i32
    return %arg0, %arg1, %c0_i32, %c0_i32_0 : i32, i32, i32, i32
  }
  func.func @transform_1(%arg0: i32, %arg1: i32) -> (i32, i32, i32) {
    %c0_i32 = arith.constant 0 : i32
    %c0_i32_0 = arith.constant 0 : i32
    %c0_i32_1 = arith.constant 0 : i32
    return %arg1, %c0_i32, %c0_i32_0 : i32, i32, i32
  }
  func.func @transform_2(%arg0: i32, %arg1: i32) -> (i32, i32, i32) {
    %c0_i32 = arith.constant 0 : i32
    %c0_i32_0 = arith.constant 0 : i32
    %c0_i32_1 = arith.constant 0 : i32
    return %arg1, %c0_i32, %c0_i32_0 : i32, i32, i32
  }
  func.func @transform_3(%arg0: i32, %arg1: i32) -> (i32, i32) {
    %c0_i32 = arith.constant 0 : i32
    %c0_i32_0 = arith.constant 0 : i32
    %c0_i32_1 = arith.constant 0 : i32
    return %c0_i32, %c0_i32_0 : i32, i32
  }
  func.func @transform_4(%arg0: i32, %arg1: i32) -> (i32, i32) {
    %c0_i32 = arith.constant 0 : i32
    %c0_i32_0 = arith.constant 0 : i32
    %c0_i32_1 = arith.constant 0 : i32
    return %c0_i32, %c0_i32_0 : i32, i32
  }
  func.func @transform_5(%arg0: i32, %arg1: i32) -> (i32, i32, i32, i32) {
    %c0_i32 = arith.constant 0 : i32
    %c0_i32_0 = arith.constant 0 : i32
    %c0_i32_1 = arith.constant 0 : i32
    return %arg0, %arg1, %c0_i32, %c0_i32_0 : i32, i32, i32, i32
  }
}

</mosaic_0001>

<bundles_post_ra>
// kernel: tpu_custom_call.1
= control target key start
LH: loop header
LB: loop body
LE: loop exit
PB: predicated region body
PF: predicated region fallthrough
CT: control target
= control target key end

     0   :  { %vm459_vm0 = vcmask 1042432   ;;  %vm818_vm9 = vcmask 130048   ;;  %s2675_s0 = inlined_call_operand.vmem [shape: f32[2,3,21,256], index: 0, kind: input, shape index: {}]   ;;  %s2676_s5 = inlined_call_operand.vmem [shape: f32[2,3,29,256], index: 5, kind: output, shape index: {}]   ;;  %s2677_s3 = inlined_call_operand.vmem [shape: f32[8,16], index: 3, kind: input, shape index: {}]   ;;  %s2678_s4 = inlined_call_operand.vmem [shape: f32[8,1], index: 4, kind: input, shape index: {}]   ;;  %s2679_s1 = inlined_call_operand.vmem [shape: f32[3,5,256], index: 1, kind: input, shape index: {}]   ;;  %s2680_s2 = inlined_call_operand.vmem [shape: f32[3,5,256], index: 2, kind: input, shape index: {}]  }
   0x1   :  { %v1448_v0 = vld [vmem:[%s2675_s0 + $0x30] sm:$0xe0]  ;;  %v1453_v1 = vld [vmem:[%s2675_s0 + $0x40] sm:$0xff]  ;;  %v1458_v2 = vld [vmem:[%s2675_s0 + $0x50] sm:$0x1f] }
   0x2   :  { %v393_v3 = vmul.f32 %v1448_v0, %v1448_v0  ;;  %v395_v4 = vmul.f32 %v1453_v1, %v1453_v1  ;;  %v397_v5 = vmul.f32 %v1458_v2, %v1458_v2  ;;  %v1469_v6 = vld [vmem:[%s2675_s0 + $0x38] sm:$0xe0]  ;;  %v1474_v7 = vld [vmem:[%s2675_s0 + $0x48] sm:$0xff]  ;;  %v1479_v8 = vld [vmem:[%s2675_s0 + $0x58] sm:$0x1f] }
   0x3   :  { %v394_v9 = vmul.f32 %v1469_v6, %v1469_v6  ;;  %v396_v10 = vmul.f32 %v1474_v7, %v1474_v7  ;;  %v398_v11 = vmul.f32 %v1479_v8, %v1479_v8  ;;  %v1490_v12 = vld [vmem:[%s2675_s0 + $0x90] sm:$0xe0]  ;;  %v1495_v13 = vld [vmem:[%s2675_s0 + $0xa0] sm:$0xff]  ;;  %v1500_v14 = vld [vmem:[%s2675_s0 + $0xb0] sm:$0x1f] }
   0x4   :  { %v470_v15 = vrot.slane %v393_v3, 5  ;;  %v471_v16 = vrot.slane %v395_v4, 5  ;;  %v476_v17 = vrot.slane %v397_v5, 5  ;;  %v405_v18 = vmul.f32 %v1490_v12, %v1490_v12  ;;  %v1509_v23 = vld [vmem:[%s2675_s0 + $0x98] sm:$0xe0]  ;;  %v1514_v24 = vld [vmem:[%s2675_s0 + $0xa8] sm:$0xff] }
   0x5   :  { %v473_v19 = vrot.slane %v394_v9, 5  ;;  %v474_v20 = vrot.slane %v396_v10, 5  ;;  %v478_v21 = vrot.slane %v398_v11, 5  ;;  %v407_v22 = vmul.f32 %v1495_v13, %v1495_v13  ;;  %v1523_v29 = vld [vmem:[%s2675_s0 + $0xb8] sm:$0x1f]  ;;  %v1539_v39 = vld [vmem:[%s2675_s0 + $0x10] sm:$0xff] }
   0x6   :  { %v472_v25 = vsel %vm459_vm0, %v470_v15, %v471_v16  ;;  %v477_v26 = vsel %vm459_vm0, %v471_v16, %v476_v17  ;;  %v409_v27 = vmul.f32 %v1500_v14, %v1500_v14  ;;  %v490_v28 = vrot.slane %v405_v18, 5  ;;  %v1528_v30 = vld [vmem:[%s2675_s0] sm:$0xe0]  ;;  %v1547_v43 = vld [vmem:[%s2675_s0 + $0x20] sm:$0x1f]  ;;  %v1565_v58 = vld [vmem:[%s2675_s0 + $0x18] sm:$0xff] }
   0x7   :  { %v558_v31 = vadd.f32 %v477_v26, %v472_v25  ;;  %v475_v32 = vsel %vm459_vm0, %v473_v19, %v474_v20  ;;  %v479_v33 = vsel %vm459_vm0, %v474_v20, %v478_v21  ;;  %v491_v34 = vrot.slane %v407_v22, 5  ;;  %v1557_v53 = vld [vmem:[%s2675_s0 + $0x8] sm:$0xe0]  ;;  %v1571_v63 = vld [vmem:[%s2675_s0 + $0x28] sm:$0x1f] }
   0x8   :  { %v565_v35 = vadd.f32 %v479_v33, %v475_v32  ;;  %v496_v36 = vrot.slane %v409_v27, 5  ;;  %v406_v37 = vmul.f32 %v1509_v23, %v1509_v23  ;;  %v408_v38 = vmul.f32 %v1514_v24, %v1514_v24  ;;  %v1584_v26 = vld [vmem:[%s2675_s0 + $0x60] sm:$0xe0] }
   0x9   :  { %v559_v40 = vrot.slane %v558_v31, 4  ;;  %v492_v41 = vsel %vm459_vm0, %v490_v28, %v491_v34  ;;  %v410_v42 = vmul.f32 %v1523_v29, %v1523_v29  ;;  %v387_v44 = vmul.f32 %v1528_v30, %v1528_v30 }
   0xa   :  { %v566_v45 = vrot.slane %v565_v35, 4  ;;  %v497_v46 = vsel %vm459_vm0, %v491_v34, %v496_v36  ;;  %v493_v47 = vrot.slane %v406_v37, 5  ;;  %v494_v48 = vrot.slane %v408_v38, 5  ;;  %v1589_v37 = vld [vmem:[%s2675_s0 + $0x70] sm:$0xff] }
   0xb   :  { %v560_v49 = vadd.f32 %v559_v40, %v558_v31  ;;  %v586_v50 = vadd.f32 %v497_v46, %v492_v41  ;;  %v498_v51 = vrot.slane %v410_v42, 5  ;;  %v389_v52 = vmul.f32 %v1539_v39, %v1539_v39 }
   0xc   :  { %v567_v54 = vadd.f32 %v566_v45, %v565_v35  ;;  %v495_v55 = vsel %vm459_vm0, %v493_v47, %v494_v48  ;;  %v391_v56 = vmul.f32 %v1547_v43, %v1547_v43  ;;  %v460_v57 = vrot.slane %v387_v44, 5 }
   0xd   :  { %v561_v59 = vrot.slane %v560_v49, 2  ;;  %v587_v60 = vrot.slane %v586_v50, 4  ;;  %v499_v61 = vsel %vm459_vm0, %v494_v48, %v498_v51  ;;  %v461_v62 = vrot.slane %v389_v52, 5  ;;  %v1602_v51 = vld [vmem:[%s2675_s0 + $0x80] sm:$0x1f] }
   0xe   :  { %v568_v3 = vrot.slane %v567_v54, 2  ;;  %v593_v4 = vadd.f32 %v499_v61, %v495_v55  ;;  %v466_v5 = vrot.slane %v391_v56, 5  ;;  %v388_v9 = vmul.f32 %v1557_v53, %v1557_v53 }
   0xf   :  { %v562_v10 = vadd.f32 %v561_v59, %v560_v49  ;;  %v588_v11 = vadd.f32 %v587_v60, %v586_v50  ;;  %v462_v15 = vsel %vm459_vm0, %v460_v57, %v461_v62  ;;  %v390_v16 = vmul.f32 %v1565_v58, %v1565_v58  ;;  %v1611_v59 = vld [vmem:[%s2675_s0 + $0x68] sm:$0xe0] }
  0x10   :  { %v569_v17 = vadd.f32 %v568_v3, %v567_v54  ;;  %v594_v18 = vrot.slane %v593_v4, 4  ;;  %v467_v19 = vsel %vm459_vm0, %v461_v62, %v466_v5  ;;  %v392_v20 = vmul.f32 %v1571_v63, %v1571_v63 }
  0x11   :  { %v563_v21 = vrot.slane %v562_v10, 1  ;;  %v589_v22 = vrot.slane %v588_v11, 2  ;;  %v544_v25 = vadd.f32 %v467_v19, %v462_v15  ;;  %v463_v31 = vrot.slane %v388_v9, 5 }
  0x12   :  { %v570_v27 = vrot.slane %v569_v17, 1  ;;  %v595_v28 = vadd.f32 %v594_v18, %v593_v4  ;;  %v464_v32 = vrot.slane %v390_v16, 5  ;;  %v468_v36 = vrot.slane %v392_v20, 5  ;;  %v1620_v4 = vld [vmem:[%s2675_s0 + $0x78] sm:$0xff] }
  0x13   :  { %v564_v33 = vadd.f32 %v563_v21, %v562_v10  ;;  %v590_v34 = vadd.f32 %v589_v22, %v588_v11  ;;  %v545_v35 = vrot.slane %v544_v25, 4  ;;  %v399_v42 = vmul.f32 %v1584_v26, %v1584_v26  ;;  %v1625_v11 = vld [vmem:[%s2675_s0 + $0x88] sm:$0x1f] }
  0x14   :  { %v571_v38 = vadd.f32 %v570_v27, %v569_v17  ;;  %v596_v40 = vrot.slane %v595_v28, 2  ;;  %v465_v41 = vsel %vm459_vm0, %v463_v31, %v464_v32  ;;  %v469_v47 = vsel %vm459_vm0, %v464_v32, %v468_v36 }
  0x15   :  { %v1594_v44 = vmax.f32 %v564_v33, 1e-24  ;;  %v591_v45 = vrot.slane %v590_v34, 1  ;;  %v546_v46 = vadd.f32 %v545_v35, %v544_v25  ;;  %v551_v50 = vadd.f32 %v469_v47, %v465_v41 }
  0x16   :  { %v1597_v48 = vmax.f32 %v571_v38, 1e-24  ;;  %v597_v49 = vadd.f32 %v596_v40, %v595_v28  ;;  %v401_v52 = vmul.f32 %v1589_v37, %v1589_v37  ;;  %v403_v62 = vmul.f32 %v1602_v51, %v1602_v51 }
  0x17   :  { %1318 = vrsqrt.f32 %v1594_v44  ;;  %v592_v54 = vadd.f32 %v591_v45, %v590_v34  ;;  %v547_v55 = vrot.slane %v546_v46, 2  ;;  %v552_v57 = vrot.slane %v551_v50, 4 }
  0x18   :  { %1320 = vrsqrt.f32 %v1597_v48  ;;  %v598_v56 = vrot.slane %v597_v49, 1  ;;  %v480_v3 = vrot.slane %v399_v42, 5  ;;  %v481_v10 = vrot.slane %v401_v52, 5 }
  0x19   :  { %v1613_v60 = vmax.f32 %v592_v54, 1e-24  ;;  %v548_v61 = vadd.f32 %v547_v55, %v546_v46  ;;  %v553_v9 = vadd.f32 %v552_v57, %v551_v50  ;;  %v486_v16 = vrot.slane %v403_v62, 5 }
  0x1a   :  { %v599_v5 = vadd.f32 %v598_v56, %v597_v49  ;;  %v400_v17 = vmul.f32 %v1611_v59, %v1611_v59  ;;  %vm666_vm1 = vweird.f32 %v1594_v44  ;;  %v402_v20 = vmul.f32 %v1620_v4, %v1620_v4 }
  0x1b   :  { %1322 = vrsqrt.f32 %v1613_v60  ;;  %v549_v15 = vrot.slane %v548_v61, 1  ;;  %v554_v19 = vrot.slane %v553_v9, 2  ;;  %v482_v25 = vsel %vm459_vm0, %v480_v3, %v481_v10 }
  0x1c   :  { %v1631_v18 = vmax.f32 %v599_v5, 1e-24  ;;  %v487_v27 = vsel %vm459_vm0, %v481_v10, %v486_v16  ;;  %v404_v28 = vmul.f32 %v1625_v11, %v1625_v11  ;;  %vm676_vm2 = vweird.f32 %v1597_v48 }
  0x1d   :  { %v1319_v21 = vpop.eup %1318  ;;  %v550_v22 = vadd.f32 %v549_v15, %v548_v61  ;;  %vm706_vm3 = vweird.f32 %v1613_v60  ;;  %v555_v35 = vadd.f32 %v554_v19, %v553_v9  ;;  %v483_v36 = vrot.slane %v400_v17, 5 }
  0x1e   :  { %v1321_v31 = vpop.eup %1320  ;;  %v661_v32 = vmul.f32 %v1319_v21, %v1594_v44  ;;  %1324 = vrsqrt.f32 %v1631_v18  ;;  %v572_v40 = vadd.f32 %v487_v27, %v482_v25  ;;  %v484_v41 = vrot.slane %v402_v20, 5 }
  0x1f   :  { %v671_v33 = vmul.f32 %v1321_v31, %v1597_v48  ;;  %v1644_v34 = vmax.f32 %v550_v22, 1e-24  ;;  %v488_v42 = vrot.slane %v404_v28, 5  ;;  %vm667_vm4 = vweird.f32 %v1319_v21 }
  0x20   :  { %v662_v38 = vmul.f32 %v1319_v21, %v661_v32  ;;  %v556_v47 = vrot.slane %v555_v35, 1  ;;  %vm677_vm5 = vweird.f32 %v1321_v31  ;;  %v573_v52 = vrot.slane %v572_v40, 4  ;;  %vm1659_vm6 = vmor %vm666_vm1, %vm667_vm4 }
  0x21   :  { %v1323_v45 = vpop.eup %1322  ;;  %v672_v46 = vmul.f32 %v1321_v31, %v671_v33  ;;  %1326 = vrsqrt.f32 %v1644_v34  ;;  %v485_v56 = vsel %vm459_vm0, %v483_v36, %v484_v41  ;;  %v489_v57 = vsel %vm459_vm0, %v484_v41, %v488_v42  ;;  %vm1671_vm8 = vmor %vm676_vm2, %vm677_vm5 }
  0x22   :  { %v663_v49 = vmul.f32 0.5, %v662_v38  ;;  %v701_v50 = vmul.f32 %v1323_v45, %v1613_v60  ;;  %v557_v55 = vadd.f32 %v556_v47, %v555_v35  ;;  %v1652_v5 = vadd.f32 %v573_v52, %v572_v40 }
  0x23   :  { %v673_v54 = vmul.f32 0.5, %v672_v46  ;;  %v1654_v9 = vadd.f32 %v489_v57, %v485_v56  ;;  %vm716_vm7 = vweird.f32 %v1631_v18  ;;  %vm707_vm10 = vweird.f32 %v1323_v45 }
  0x24   :  { %v1650_v61 = vpop.eup %1324  ;;  %v664_v62 = vsub.f32 1.5, %v663_v49  ;;  %v702_v3 = vmul.f32 %v1323_v45, %v701_v50  ;;  %v1666_v17 = vmax.f32 %v557_v55, 1e-24  ;;  %v575_v28 = vrot.slane %v1652_v5, 2  ;;  %vm1697_vm13 = vmor %vm706_vm3, %vm707_vm10 }
  0x25   :  { %v674_v15 = vsub.f32 1.5, %v673_v54  ;;  %v711_v16 = vmul.f32 %v1650_v61, %v1631_v18  ;;  %vm717_vm11 = vweird.f32 %v1650_v61  ;;  %vm646_vm12 = vweird.f32 %v1644_v34 }
  0x26   :  { %v665_v19 = vmul.f32 %v1319_v21, %v664_v62  ;;  %v703_v44 = vmul.f32 0.5, %v702_v3  ;;  %1328 = vrsqrt.f32 %v1666_v17  ;;  %v580_v35 = vrot.slane %v1654_v9, 4  ;;  %v1734_v62 = vld [vmem:[%s2677_s3] sm:$0xff]  ;;  %vm1744_vm15 = vmor %vm716_vm7, %vm717_vm11 }
  0x27   :  { %v1676_v22 = vpop.eup %1326  ;;  %v675_v25 = vmul.f32 %v1321_v31, %v674_v15  ;;  %v712_v27 = vmul.f32 %v1650_v61, %v711_v16  ;;  %vm656_vm14 = vweird.f32 %v1666_v17  ;;  %v576_v18 = vadd.f32 %v575_v28, %v1652_v5 }
  0x28   :  { %v669_v48 = vsel %vm1659_vm6, %v1319_v21, %v665_v19  ;;  %v704_v32 = vsub.f32 1.5, %v703_v44  ;;  %v641_v33 = vmul.f32 %v1676_v22, %v1644_v34  ;;  %vm647_vm1 = vweird.f32 %v1676_v22 }
  0x29   :  { %v768_v36 = vmul.f32 %v669_v48, %v1453_v1  ;;  %v770_v38 = vmul.f32 %v669_v48, %v1458_v2  ;;  %v679_v40 = vsel %vm1671_vm8, %v1321_v31, %v675_v25  ;;  %v1692_v41 = vmul.f32 %v669_v48, %v1448_v0  ;;  %vm648_vm3 = vmor %vm646_vm12, %vm647_vm1 }
  0x2a   :  { %v769_v42 = vmul.f32 %v679_v40, %v1474_v7  ;;  %v771_v46 = vmul.f32 %v679_v40, %v1479_v8  ;;  %v1704_v1 = vmul.f32 %v679_v40, %v1469_v6  ;;  %v705_v2 = vmul.f32 %v1323_v45, %v704_v32 }
  0x2b   :  { %v869_v47 = vrot.slane %v768_v36, 5  ;;  %v874_v31 = vrot.slane %v770_v38, 5  ;;  %1252 = vst [vmem:[%s2676_s5 + $0x60] sm:$0xff] %v768_v36  ;;  %v868_v0 = vrot.slane %v1692_v41, 5  ;;  %v713_v60 = vmul.f32 0.5, %v712_v27 }
  0x2c   :  { %1254 = vst [vmem:[%s2676_s5 + $0x70] sm:$0x1f] %v770_v38  ;;  %v872_v7 = vrot.slane %v769_v42, 5  ;;  %v876_v8 = vrot.slane %v771_v46, 5  ;;  %v871_v6 = vrot.slane %v1704_v1, 5  ;;  %v709_v49 = vsel %vm1697_vm13, %v1323_v45, %v705_v2  ;;  %v1717_v50 = vpop.eup %1328 }
  0x2d   :  { %v875_v52 = vsel %vm459_vm0, %v869_v47, %v874_v31  ;;  %1253 = vst [vmem:[%s2676_s5 + $0x68] sm:$0xff] %v769_v42  ;;  %v870_v54 = vsel %vm459_vm0, %v868_v0, %v869_v47  ;;  %v780_v55 = vmul.f32 %v709_v49, %v1495_v13  ;;  %v782_v56 = vmul.f32 %v709_v49, %v1500_v14 }
  0x2e   :  { %896 = vmatpush.msra.mxu2 %v875_v52  ;;  %v877_v57 = vsel %vm459_vm0, %v872_v7, %v876_v8  ;;  %1255 = vst [vmem:[%s2676_s5 + $0x78] sm:$0x1f] %v771_v46  ;;  %v873_v45 = vsel %vm459_vm0, %v871_v6, %v872_v7  ;;  %v714_v3 = vsub.f32 1.5, %v713_v60  ;;  %v642_v10 = vmul.f32 %v1676_v22, %v641_v33  ;;  %v1817_v6 = vld [vmem:[%s2675_s0 + $0x100] sm:$0xff] }
  0x2f   :  { %916 = vmatpush.msra.mxu3 %v877_v57  ;;  %v989_v13 = vrot.slane %v780_v55, 5  ;;  %v994_v14 = vrot.slane %v782_v56, 5  ;;  %1268 = vst [vmem:[%s2676_s5 + $0xe0] sm:$0xff] %v780_v55  ;;  %v651_v16 = vmul.f32 %v1717_v50, %v1666_v17  ;;  %v1756_v44 = vmul.f32 %v709_v49, %v1490_v12 }
  0x30   :  { %897 = vmatpush.msra.mxu2 %v870_v54  ;;  %1270 = vst [vmem:[%s2676_s5 + $0xf0] sm:$0x1f] %v782_v56  ;;  %v715_v19 = vmul.f32 %v1650_v61, %v714_v3  ;;  %v643_v20 = vmul.f32 0.5, %v642_v10  ;;  %vm657_vm2 = vweird.f32 %v1717_v50  ;;  %v581_v48 = vadd.f32 %v580_v35, %v1654_v9 }
  0x31   :  { %917 = vmatpush.msra.mxu3 %v873_v45  ;;  %1306 = vmatmul.msk.f32.vlgmr.msra.gmra.mxu2 %vm818_vm9, %v1734_v62  ;;  %v995_v25 = vsel %vm459_vm0, %v989_v13, %v994_v14  ;;  %v652_v27 = vmul.f32 %v1717_v50, %v651_v16  ;;  %v988_v28 = vrot.slane %v1756_v44, 5  ;;  %v577_v32 = vrot.slane %v576_v18, 1  ;;  %vm1799_vm4 = vmor %vm656_vm14, %vm657_vm2 }
  0x32   :  { %1307 = vmatmul.msk.f32.vlgmr.msra.gmra.mxu3 %vm818_vm9, %v1734_v62  ;;  %1016 = vmatpush.msrb.mxu2 %v995_v25  ;;  %v719_v12 = vsel %vm1744_vm15, %v1650_v61, %v715_v19  ;;  %v644_v5 = vsub.f32 1.5, %v643_v20  ;;  %v582_v21 = vrot.slane %v581_v48, 2  ;;  %v1868_v19 = vld [vmem:[%s2675_s0 + $0x118] sm:$0x1f] }
  0x33   :  { %v781_v33 = vmul.f32 %v719_v12, %v1514_v24  ;;  %v783_v36 = vmul.f32 %v719_v12, %v1523_v29  ;;  %v653_v9 = vmul.f32 0.5, %v652_v27  ;;  %v1778_v35 = vmul.f32 %v719_v12, %v1509_v23  ;;  %v1785_v24 = vld [vmem:[%s2675_s0 + $0xf0] sm:$0xe0] }
  0x34   :  { %v645_v38 = vmul.f32 %v1676_v22, %v644_v5  ;;  %v990_v61 = vsel %vm459_vm0, %v988_v28, %v989_v13  ;;  %v578_v40 = vadd.f32 %v577_v32, %v576_v18  ;;  %v583_v31 = vadd.f32 %v582_v21, %v581_v48 }
  0x35   :  { %v992_v29 = vrot.slane %v781_v33, 5  ;;  %v996_v42 = vrot.slane %v783_v36, 5  ;;  %1269 = vst [vmem:[%s2676_s5 + $0xe8] sm:$0xff] %v781_v33  ;;  %v654_v34 = vsub.f32 1.5, %v653_v9  ;;  %1017 = vmatpush.msrb.mxu2 %v990_v61  ;;  %v991_v23 = vrot.slane %v1778_v35, 5  ;;  %v1894_v9 = vld [vmem:[%s2675_s0 + $0xd0] sm:$0xff] }
  0x36   :  { %1271 = vst [vmem:[%s2676_s5 + $0xf8] sm:$0x1f] %v783_v36  ;;  %v649_v46 = vsel %vm648_vm3, %v1676_v22, %v645_v38  ;;  %v1803_v47 = vmax.f32 %v578_v40, 1e-24  ;;  %v584_v54 = vrot.slane %v583_v31, 1 }
  0x37   :  { %v997_v0 = vsel %vm459_vm0, %v992_v29, %v996_v42  ;;  %v762_v60 = vmul.f32 %v649_v46, %v1539_v39  ;;  %v764_v7 = vmul.f32 %v649_v46, %v1547_v43  ;;  %v655_v8 = vmul.f32 %v1717_v50, %v654_v34  ;;  %v1822_v39 = vld [vmem:[%s2675_s0 + $0x110] sm:$0x1f]  ;;  %v1884_v33 = vld [vmem:[%s2675_s0 + $0xc0] sm:$0xe0]  ;;  %v1899_v38 = vld [vmem:[%s2675_s0 + $0xe0] sm:$0x1f] }
  0x38   :  { %1036 = vmatpush.msrb.mxu3 %v997_v0  ;;  %v993_v22 = vsel %vm459_vm0, %v991_v23, %v992_v29  ;;  %v1811_v17 = vmul.f32 %v649_v46, %v1528_v30  ;;  %1330 = vrsqrt.f32 %v1803_v47  ;;  %v417_v43 = vmul.f32 %v1785_v24, %v1785_v24  ;;  %v1904_v61 = vld [vmem:[%s2675_s0 + $0xc8] sm:$0xe0] }
  0x39   :  { %v805_v49 = vrot.slane %v762_v60, 5  ;;  %v810_v52 = vrot.slane %v764_v7, 5  ;;  %1244 = vst [vmem:[%s2676_s5 + $0x20] sm:$0xff] %v762_v60  ;;  %v659_v30 = vsel %vm1799_vm4, %v1717_v50, %v655_v8  ;;  %1310 = vmatmul.msk.f32.vlgmr.msrb.gmra.mxu2 %vm818_vm9, %v1734_v62  ;;  %v1846_v50 = vld [vmem:[%s2675_s0 + $0xf8] sm:$0xe0]  ;;  %v585_v10 = vadd.f32 %v584_v54, %v583_v31 }
  0x3a   :  { %1246 = vst [vmem:[%s2676_s5 + $0x30] sm:$0x1f] %v764_v7  ;;  %v763_v55 = vmul.f32 %v659_v30, %v1565_v58  ;;  %v765_v56 = vmul.f32 %v659_v30, %v1571_v63  ;;  %1037 = vmatpush.msrb.mxu3 %v993_v22  ;;  %v804_v57 = vrot.slane %v1811_v17, 5  ;;  %v1841_v45 = vmul.f32 %v659_v30, %v1557_v53  ;;  %v1858_v53 = vld [vmem:[%s2675_s0 + $0x108] sm:$0xff]  ;;  %v1915_v31 = vld [vmem:[%s2675_s0 + $0xd8] sm:$0xff] }
  0x3b   :  { %v811_v3 = vsel %vm459_vm0, %v805_v49, %v810_v52  ;;  %1311 = vmatmul.msk.f32.vlgmr.msrb.gmra.mxu3 %vm818_vm9, %v1734_v62  ;;  %v419_v58 = vmul.f32 %v1817_v6, %v1817_v6  ;;  %v421_v63 = vmul.f32 %v1822_v39, %v1822_v39  ;;  %v1873_v20 = vmax.f32 %v585_v10, 1e-24  ;;  %v1927_v8 = vld [vmem:[%s2675_s0 + $0xe8] sm:$0x1f] }
  0x3c   :  { %836 = vmatpush.msra.mxu0 %v811_v3  ;;  %v808_v13 = vrot.slane %v763_v55, 5  ;;  %v812_v14 = vrot.slane %v765_v56, 5  ;;  %1245 = vst [vmem:[%s2676_s5 + $0x28] sm:$0xff] %v763_v55  ;;  %v806_v15 = vsel %vm459_vm0, %v804_v57, %v805_v49  ;;  %v807_v16 = vrot.slane %v1841_v45, 5 }
  0x3d   :  { %1247 = vst [vmem:[%s2676_s5 + $0x38] sm:$0x1f] %v765_v56  ;;  %v510_v18 = vrot.slane %v417_v43, 5  ;;  %v511_v25 = vrot.slane %v419_v58, 5  ;;  %v418_v27 = vmul.f32 %v1846_v50, %v1846_v50  ;;  %v516_v28 = vrot.slane %v421_v63, 5 }
  0x3e   :  { %v1331_v48 = vpop.eup %1330  ;;  %v813_v12 = vsel %vm459_vm0, %v808_v13, %v812_v14  ;;  %837 = vmatpush.msra.mxu0 %v806_v15  ;;  %v809_v5 = vsel %vm459_vm0, %v807_v16, %v808_v13  ;;  %v420_v32 = vmul.f32 %v1858_v53, %v1858_v53  ;;  %vm686_vm5 = vweird.f32 %v1803_v47 }
  0x3f   :  { %856 = vmatpush.msra.mxu1 %v813_v12  ;;  %1304 = vmatmul.msk.f32.vlgmr.msra.gmra.mxu0 %vm818_vm9, %v1734_v62  ;;  %v681_v36 = vmul.f32 %v1331_v48, %v1803_v47  ;;  %vm687_vm6 = vweird.f32 %v1331_v48  ;;  %1332 = vrsqrt.f32 %v1873_v20  ;;  %v512_v40 = vsel %vm459_vm0, %v510_v18, %v511_v25 }
  0x40   :  { %v517_v21 = vsel %vm459_vm0, %v511_v25, %v516_v28  ;;  %v422_v29 = vmul.f32 %v1868_v19, %v1868_v19  ;;  %v513_v42 = vrot.slane %v418_v27, 5  ;;  %v514_v46 = vrot.slane %v420_v32, 5  ;;  %vm688_vm8 = vmor %vm686_vm5, %vm687_vm6 }
  0x41   :  { %857 = vmatpush.msra.mxu1 %v809_v5  ;;  %v682_v34 = vmul.f32 %v1331_v48, %v681_v36  ;;  %v614_v23 = vadd.f32 %v517_v21, %v512_v40  ;;  %v411_v2 = vmul.f32 %v1884_v33, %v1884_v33  ;;  %vm696_vm7 = vweird.f32 %v1873_v20 }
  0x42   :  { %1305 = vmatmul.msk.f32.vlgmr.msra.gmra.mxu1 %vm818_vm9, %v1734_v62  ;;  %v518_v0 = vrot.slane %v422_v29, 5  ;;  %v413_v60 = vmul.f32 %v1894_v9, %v1894_v9  ;;  %v415_v7 = vmul.f32 %v1899_v38, %v1899_v38  ;;  %v412_v22 = vmul.f32 %v1904_v61, %v1904_v61 }
  0x43   :  { %v683_v43 = vmul.f32 0.5, %v682_v34  ;;  %v615_v49 = vrot.slane %v614_v23, 4  ;;  %v515_v52 = vsel %vm459_vm0, %v513_v42, %v514_v46  ;;  %v500_v30 = vrot.slane %v411_v2, 5 }
  0x44   :  { %v519_v54 = vsel %vm459_vm0, %v514_v46, %v518_v0  ;;  %v501_v55 = vrot.slane %v413_v60, 5  ;;  %v506_v56 = vrot.slane %v415_v7, 5  ;;  %v414_v57 = vmul.f32 %v1915_v31, %v1915_v31 }
  0x45   :  { %v1333_v3 = vpop.eup %1332  ;;  %v684_v10 = vsub.f32 1.5, %v683_v43  ;;  %v616_v58 = vadd.f32 %v615_v49, %v614_v23  ;;  %v621_v63 = vadd.f32 %v519_v54, %v515_v52  ;;  %v416_v13 = vmul.f32 %v1927_v8, %v1927_v8 }
  0x46   :  { %v691_v14 = vmul.f32 %v1333_v3, %v1873_v20  ;;  %vm697_vm10 = vweird.f32 %v1333_v3  ;;  %v502_v15 = vsel %vm459_vm0, %v500_v30, %v501_v55  ;;  %v507_v16 = vsel %vm459_vm0, %v501_v55, %v506_v56 }
  0x47   :  { %v685_v18 = vmul.f32 %v1331_v48, %v684_v10  ;;  %v617_v25 = vrot.slane %v616_v58, 2  ;;  %v622_v27 = vrot.slane %v621_v63, 4  ;;  %v600_v12 = vadd.f32 %v507_v16, %v502_v15  ;;  %vm698_vm11 = vmor %vm696_vm7, %vm697_vm10 }
  0x48   :  { %v692_v5 = vmul.f32 %v1333_v3, %v691_v14  ;;  %v503_v28 = vrot.slane %v412_v22, 5  ;;  %v504_v32 = vrot.slane %v414_v57, 5  ;;  %v508_v36 = vrot.slane %v416_v13, 5 }
  0x49   :  { %v689_v40 = vsel %vm688_vm8, %v1331_v48, %v685_v18  ;;  %v618_v21 = vadd.f32 %v617_v25, %v616_v58  ;;  %v623_v29 = vadd.f32 %v622_v27, %v621_v63  ;;  %v601_v47 = vrot.slane %v600_v12, 4 }
  0x4a   :  { %v774_v42 = vmul.f32 %v689_v40, %v1589_v37  ;;  %v776_v34 = vmul.f32 %v689_v40, %v1602_v51  ;;  %v693_v23 = vmul.f32 0.5, %v692_v5  ;;  %v1946_v46 = vmul.f32 %v689_v40, %v1584_v26 }
  0x4b   :  { %v619_v2 = vrot.slane %v618_v21, 1  ;;  %v624_v0 = vrot.slane %v623_v29, 2  ;;  %v602_v60 = vadd.f32 %v601_v47, %v600_v12  ;;  %v505_v7 = vsel %vm459_vm0, %v503_v28, %v504_v32 }
  0x4c   :  { %v929_v22 = vrot.slane %v774_v42, 5  ;;  %v934_v43 = vrot.slane %v776_v34, 5  ;;  %1260 = vst [vmem:[%s2676_s5 + $0xa0] sm:$0xff] %v774_v42  ;;  %v694_v48 = vsub.f32 1.5, %v693_v23  ;;  %v928_v37 = vrot.slane %v1946_v46, 5 }
  0x4d   :  { %1262 = vst [vmem:[%s2676_s5 + $0xb0] sm:$0x1f] %v776_v34  ;;  %v620_v26 = vadd.f32 %v619_v2, %v618_v21  ;;  %v625_v51 = vadd.f32 %v624_v0, %v623_v29  ;;  %v603_v49 = vrot.slane %v602_v60, 2  ;;  %v509_v52 = vsel %vm459_vm0, %v504_v32, %v508_v36  ;;  %v797_v32 = vld [vmem:[%s2678_s4] sm:$0xff] }
  0x4e   :  { %v935_v30 = vsel %vm459_vm0, %v929_v22, %v934_v43  ;;  %v695_v54 = vmul.f32 %v1333_v3, %v694_v48  ;;  %v930_v55 = vsel %vm459_vm0, %v928_v37, %v929_v22  ;;  %v607_v56 = vadd.f32 %v509_v52, %v505_v7 }
  0x4f   :  { %956 = vmatpush.msrb.mxu0 %v935_v30  ;;  %v638_v57 = vmax.f32 %v620_v26, 1e-24  ;;  %v626_v10 = vrot.slane %v625_v51, 1  ;;  %v604_v58 = vadd.f32 %v603_v49, %v602_v60  ;;  %v1414_v5 = vmov 0  }
  0x50   :  { %v699_v63 = vsel %vm698_vm11, %v1333_v3, %v695_v54  ;;  %v608_v13 = vrot.slane %v607_v56, 4  ;;  %1317 = vset.pattern.permute.xlu0 %v1414_v5 }
  0x51   :  { %v775_v20 = vmul.f32 %v699_v63, %v1620_v4  ;;  %v777_v14 = vmul.f32 %v699_v63, %v1625_v11  ;;  %1334 = vrsqrt.f32 %v638_v57  ;;  %957 = vmatpush.msrb.mxu0 %v930_v55  ;;  %v627_v15 = vadd.f32 %v626_v10, %v625_v51  ;;  %1164 = vperm.xlu0 %1317, %v797_v32  }
  0x52   :  { %v1965_v16 = vmul.f32 %v699_v63, %v1611_v59  ;;  %1308 = vmatmul.msk.f32.vlgmr.msrb.gmra.mxu0 %vm818_vm9, %v1734_v62  ;;  %v605_v18 = vrot.slane %v604_v58, 1  ;;  %v609_v25 = vadd.f32 %v608_v13, %v607_v56  ;;  %vm746_vm12 = vweird.f32 %v638_v57 }
  0x53   :  { %v932_v27 = vrot.slane %v775_v20, 5  ;;  %v936_v12 = vrot.slane %v777_v14, 5  ;;  %1261 = vst [vmem:[%s2676_s5 + $0xa8] sm:$0xff] %v775_v20  ;;  %v639_v4 = vmax.f32 %v627_v15, 1e-24 }
  0x54   :  { %1263 = vst [vmem:[%s2676_s5 + $0xb8] sm:$0x1f] %v777_v14  ;;  %v931_v11 = vrot.slane %v1965_v16, 5  ;;  %v606_v59 = vadd.f32 %v605_v18, %v604_v58  ;;  %v610_v3 = vrot.slane %v609_v25, 2 }
  0x55   :  { %v937_v28 = vsel %vm459_vm0, %v932_v27, %v936_v12  ;;  %1336 = vrsqrt.f32 %v639_v4  ;;  %vm756_vm15 = vweird.f32 %v639_v4 }
  0x56   :  { %976 = vmatpush.msrb.mxu1 %v937_v28  ;;  %v933_v36 = vsel %vm459_vm0, %v931_v11, %v932_v27  ;;  %v636_v40 = vmax.f32 %v606_v59, 1e-24  ;;  %v611_v29 = vadd.f32 %v610_v3, %v609_v25 }
  0x57   :  { %v1335_v21 = vpop.eup %1334 }
  0x58   :  { %v741_v47 = vmul.f32 %v1335_v21, %v638_v57  ;;  %977 = vmatpush.msrb.mxu1 %v933_v36  ;;  %1338 = vrsqrt.f32 %v636_v40  ;;  %v612_v42 = vrot.slane %v611_v29, 1  ;;  %vm747_vm13 = vweird.f32 %v1335_v21 }
  0x59   :  { %1309 = vmatmul.msk.f32.vlgmr.msrb.gmra.mxu1 %vm818_vm9, %v1734_v62  ;;  %vm748_vm14 = vmor %vm746_vm12, %vm747_vm13  ;;  %vm726_vm3 = vweird.f32 %v636_v40 }
  0x5a   :  { %v742_v34 = vmul.f32 %v1335_v21, %v741_v47  ;;  %v613_v23 = vadd.f32 %v612_v42, %v611_v29 }
  0x5b   :  { %v1337_v2 = vpop.eup %1336 }
  0x5c   :  { %v743_v0 = vmul.f32 0.5, %v742_v34  ;;  %v751_v60 = vmul.f32 %v1337_v2, %v639_v4  ;;  %v1983_v7 = vmax.f32 %v613_v23, 1e-24  ;;  %vm757_vm1 = vweird.f32 %v1337_v2 }
  0x5d   :  { %vm758_vm2 = vmor %vm756_vm15, %vm757_vm1 }
  0x5e   :  { %v1339_v22 = vpop.eup %1338  ;;  %v744_v43 = vsub.f32 1.5, %v743_v0  ;;  %v752_v48 = vmul.f32 %v1337_v2, %v751_v60  ;;  %1340 = vrsqrt.f32 %v1983_v7  ;;  %vm736_vm6 = vweird.f32 %v1983_v7 }
  0x5f   :  { %v721_v37 = vmul.f32 %v1339_v22, %v636_v40  ;;  %vm727_vm4 = vweird.f32 %v1339_v22 }
  0x60   :  { %v745_v26 = vmul.f32 %v1335_v21, %v744_v43  ;;  %v753_v51 = vmul.f32 0.5, %v752_v48  ;;  %vm728_vm5 = vmor %vm726_vm3, %vm727_vm4  ;;  %v21_v48 = vld [vmem:[%s2675_s0 + $0x8] sm:$0x1f] }
  0x61   :  { %v722_v49 = vmul.f32 %v1339_v22, %v721_v37  ;;  %v22_v37 = vld [vmem:[%s2675_s0 + $0x30] sm:$0x1f] }
  0x62   :  { %v749_v52 = vsel %vm748_vm14, %v1335_v21, %v745_v26  ;;  %v754_v55 = vsub.f32 1.5, %v753_v51  ;;  %v1293_v26 = vmul.f32 -1.442695, %v21_v48  ;;  %v1294_v51 = vmul.f32 -1.442695, %v22_v37 }
  0x63   :  { %v792_v30 = vmul.f32 %v749_v52, %v1817_v6  ;;  %v794_v54 = vmul.f32 %v749_v52, %v1822_v39  ;;  %v1989_v56 = vmul.f32 %v749_v52, %v1785_v24  ;;  %v723_v57 = vmul.f32 0.5, %v722_v49 }
  0x64   :  { %v1341_v10 = vpop.eup %1340  ;;  %v755_v13 = vmul.f32 %v1337_v2, %v754_v55  ;;  %v296_v52 = vlaneseq  ;;  %v264_v55 = vmul.f32 1.442695, %v22_v37 }
  0x65   :  { %v1109_v58 = vrot.slane %v792_v30, 5  ;;  %v1114_v63 = vrot.slane %v794_v54, 5  ;;  %1284 = vst [vmem:[%s2676_s5 + $0x160] sm:$0xff] %v792_v30  ;;  %v1108_v6 = vrot.slane %v1989_v56, 5  ;;  %v724_v24 = vsub.f32 1.5, %v723_v57 }
  0x66   :  { %1286 = vst [vmem:[%s2676_s5 + $0x170] sm:$0x1f] %v794_v54  ;;  %v731_v39 = vmul.f32 %v1341_v10, %v1983_v7  ;;  %v759_v14 = vsel %vm758_vm2, %v1337_v2, %v755_v13  ;;  %vm737_vm7 = vweird.f32 %v1341_v10  ;;  %v262_v30 = vmul.f32 1.442695, %v21_v48  ;;  %v2146_v48 = vld [vmem:[%s2675_s0 + $0x98] sm:$0x1f] }
  0x67   :  { %v1115_v20 = vsel %vm459_vm0, %v1109_v58, %v1114_v63  ;;  %v1110_v15 = vsel %vm459_vm0, %v1108_v6, %v1109_v58  ;;  %v793_v18 = vmul.f32 %v759_v14, %v1858_v53  ;;  %v795_v25 = vmul.f32 %v759_v14, %v1868_v19  ;;  %vm738_vm8 = vmor %vm736_vm6, %vm737_vm7 }
  0x68   :  { %1136 = vmatpush.msra.mxu2 %v1115_v20  ;;  %v2004_v27 = vmul.f32 %v759_v14, %v1846_v50  ;;  %v725_v12 = vmul.f32 %v1339_v22, %v724_v24  ;;  %v732_v4 = vmul.f32 %v1341_v10, %v731_v39  ;;  %v2071_v63 = vshrl.u32 %v296_v52, 7 }
  0x69   :  { %v1112_v11 = vrot.slane %v793_v18, 5  ;;  %v1116_v59 = vrot.slane %v795_v25, 5  ;;  %1285 = vst [vmem:[%s2676_s5 + $0x168] sm:$0xff] %v793_v18 }
  0x6a   :  { %1137 = vmatpush.msra.mxu2 %v1110_v15  ;;  %v1111_v3 = vrot.slane %v2004_v27, 5  ;;  %v729_v53 = vsel %vm728_vm5, %v1339_v22, %v725_v12  ;;  %1287 = vst [vmem:[%s2676_s5 + $0x178] sm:$0x1f] %v795_v25  ;;  %v733_v5 = vmul.f32 0.5, %v732_v4  ;;  %v24_v15 = vld [vmem:[%s2675_s0 + $0x60] sm:$0x1f] }
  0x6b   :  { %v786_v50 = vmul.f32 %v729_v53, %v1894_v9  ;;  %v788_v19 = vmul.f32 %v729_v53, %v1899_v38  ;;  %1314 = vmatmul.msk.f32.vlgmr.msra.gmra.mxu2 %vm818_vm9, %v1734_v62  ;;  %v2019_v28 = vmul.f32 %v729_v53, %v1884_v33  ;;  %v1117_v32 = vsel %vm459_vm0, %v1112_v11, %v1116_v59  ;;  %v2092_v4 = vld [vmem:[%s2675_s0 + $0x68] sm:$0x1f] }
  0x6c   :  { %v1113_v36 = vsel %vm459_vm0, %v1111_v3, %v1112_v11  ;;  %1156 = vmatpush.msra.mxu3 %v1117_v32  ;;  %v734_v9 = vsub.f32 1.5, %v733_v5  ;;  %v1296_v53 = vmul.f32 -1.442695, %v24_v15 }
  0x6d   :  { %v1049_v40 = vrot.slane %v786_v50, 5  ;;  %v1054_v21 = vrot.slane %v788_v19, 5  ;;  %1276 = vst [vmem:[%s2676_s5 + $0x120] sm:$0xff] %v786_v50  ;;  %v1048_v38 = vrot.slane %v2019_v28, 5 }
  0x6e   :  { %1278 = vst [vmem:[%s2676_s5 + $0x130] sm:$0x1f] %v788_v19  ;;  %1157 = vmatpush.msra.mxu3 %v1113_v36  ;;  %v735_v29 = vmul.f32 %v1341_v10, %v734_v9  ;;  %v2225_v19 = vld [vmem:[%s2680_s2] sm:$0x1f] }
  0x6f   :  { %v1055_v33 = vsel %vm459_vm0, %v1049_v40, %v1054_v21  ;;  %v1050_v47 = vsel %vm459_vm0, %v1048_v38, %v1049_v40  ;;  %1315 = vmatmul.msk.f32.vlgmr.msra.gmra.mxu3 %vm818_vm9, %v1734_v62  ;;  %v1297_v21 = vmul.f32 -1.442695, %v2092_v4 }
  0x70   :  { %1076 = vmatpush.msra.mxu0 %v1055_v33  ;;  %v739_v42 = vsel %vm738_vm8, %v1341_v10, %v735_v29  ;;  %vm1215_vm8 = vcmask 1044480  }
  0x71   :  { %v787_v34 = vmul.f32 %v739_v42, %v1915_v31  ;;  %v789_v23 = vmul.f32 %v739_v42, %v1927_v8  ;;  %v2040_v2 = vmul.f32 %v739_v42, %v1904_v61  ;;  %v20_v8 = vld [vmem:[%s2675_s0] sm:$0x1f] }
  0x72   :  { %1077 = vmatpush.msra.mxu0 %v1050_v47  ;;  %v1292_v22 = vmul.f32 -1.442695, %v20_v8  ;;  %v260_v43 = vmul.f32 1.442695, %v20_v8 }
  0x73   :  { %1312 = vmatmul.msk.f32.vlgmr.msra.gmra.mxu0 %vm818_vm9, %v1734_v62  ;;  %v1052_v0 = vrot.slane %v787_v34, 5  ;;  %v1056_v60 = vrot.slane %v789_v23, 5  ;;  %1277 = vst [vmem:[%s2676_s5 + $0x128] sm:$0xff] %v787_v34  ;;  %v1051_v7 = vrot.slane %v2040_v2, 5 }
  0x74   :  { %1279 = vst [vmem:[%s2676_s5 + $0x138] sm:$0x1f] %v789_v23  ;;  %1342 = vpow2.f32 %v1292_v22 }
  0x75   :  { %v1057_v31 = vsel %vm459_vm0, %v1052_v0, %v1056_v60  ;;  %v1053_v61 = vsel %vm459_vm0, %v1051_v7, %v1052_v0  ;;  %1344 = vpow2.f32 %v260_v43  ;;  %vm298_vm0 = vcmp.ge.s32.totalorder %v2071_v63, 2  ;;  %v2291_v60 = vld [vmem:[%s2680_s2 + $0x10] sm:$0x1f] }
  0x76   :  { %1096 = vmatpush.msra.mxu1 %v1057_v31  ;;  %1346 = vpow2.f32 %v1293_v26  ;;  %v2135_v31 = vld [vmem:[%s2675_s0 + $0x90] sm:$0x1f]  ;;  %v268_v43 = vmul.f32 1.442695, %v24_v15 }
  0x77   :  { %1348 = vpow2.f32 %v1294_v51 }
  0x78   :  { %1097 = vmatpush.msra.mxu1 %v1053_v61 }
  0x79   :  { %1313 = vmatmul.msk.f32.vlgmr.msra.gmra.mxu1 %vm818_vm9, %v1734_v62  ;;  %v23_v62 = vld [vmem:[%s2675_s0 + $0x38] sm:$0x1f]  ;;  %vm299_vm9 = vcmp.lt.s32.totalorder %v2071_v63, 4  ;;  %v2192_v63 = vld [vmem:[%s2679_s1] sm:$0x1f] }
  0x7a   :  { %v1295_v49 = vmul.f32 -1.442695, %v23_v62  ;;  %v1343_v54 = vpop.eup %1342  ;;  %v266_v13 = vmul.f32 1.442695, %v23_v62  ;;  %vm2176_vm7 = vmand %vm298_vm0, %vm299_vm9  ;;  %v2317_v62 = vld [vmem:[%s2680_s2 + $0x18] sm:$0x1f] }
  0x7b   :  { %v2067_v57 = vpop.eup %1344  ;;  %v2069_v10 = vadd.f32 1.0, %v1343_v54 }
  0x7c   :  { %1350 = vpow2.f32 %v1295_v49  ;;  %v1347_v58 = vpop.eup %1346  ;;  %v284_v12 = vmin.f32 %v2067_v57, 1000.0 }
  0x7d   :  { %1352 = vpow2.f32 %v262_v30  ;;  %v1349_v6 = vpop.eup %1348  ;;  %v89_v39 = vand.u32 2147483647, %v2069_v10  ;;  %v2075_v20 = vadd.f32 1.0, %v1347_v58  ;;  %v91_v18 = vand.u32 2147483648, %v2069_v10 }
  0x7e   :  { %1354 = vpow2.f32 %v264_v55  ;;  %v2077_v14 = vadd.f32 1.0, %v1349_v6  ;;  %vm85_vm10 = vweird.f32 %v2069_v10  ;;  %v1298_v58 = vmul.f32 -1.442695, %v2135_v31 }
  0x7f   :  { %1356 = vrcp.f32 %v2069_v10  ;;  %v104_v59 = vand.u32 2147483647, %v2075_v20  ;;  %v106_v3 = vand.u32 2147483648, %v2075_v20  ;;  %vm2102_vm11 = vcmp.eq.f32.partialorder %v89_v39, 8.507059e+37 }
  0x80   :  { %1358 = vpow2.f32 %v266_v13  ;;  %v119_v5 = vand.u32 2147483647, %v2077_v14  ;;  %v92_v36 = vor.u32 1.1754944e-38, %v91_v18  ;;  %vm100_vm12 = vweird.f32 %v2075_v20 }
  0x81   :  { %1360 = vrcp.f32 %v2075_v20  ;;  %v121_v40 = vand.u32 2147483648, %v2077_v14  ;;  %vm2117_vm13 = vcmp.eq.f32.partialorder %v104_v59, 8.507059e+37  ;;  %v2121_v34 = vor.u32 1.1754944e-38, %v106_v3  ;;  %v2185_v59 = vld [vmem:[%s2675_s0 + $0xc0] sm:$0x1f] }
  0x82   :  { %v1351_v24 = vpop.eup %1350  ;;  %1362 = vrcp.f32 %v2077_v14  ;;  %vm115_vm14 = vweird.f32 %v2077_v14  ;;  %vm2126_vm1 = vcmp.eq.f32.partialorder %v119_v5, 8.507059e+37  ;;  %v1300_v57 = vmul.f32 -1.442695, %v2185_v59 }
  0x83   :  { %v2083_v25 = vadd.f32 1.0, %v1351_v24  ;;  %v2094_v11 = vpop.eup %1352  ;;  %v2141_v22 = vor.u32 1.1754944e-38, %v121_v40  ;;  %v1299_v24 = vmul.f32 -1.442695, %v2146_v48 }
  0x84   :  { %v2099_v50 = vpop.eup %1354  ;;  %v285_v38 = vmin.f32 %v2094_v11, 1000.0 }
  0x85   :  { %1364 = vrcp.f32 %v2083_v25  ;;  %v1357_v32 = vpop.eup %1356  ;;  %v134_v33 = vand.u32 2147483647, %v2083_v25  ;;  %v136_v29 = vand.u32 2147483648, %v2083_v25  ;;  %v286_v7 = vmin.f32 %v2099_v50, 1000.0 }
  0x86   :  { %v81_v9 = vmul.f32 %v1357_v32, %v2069_v10  ;;  %v2115_v47 = vpop.eup %1358  ;;  %1366 = vpow2.f32 %v1296_v53  ;;  %vm86_vm15 = vweird.f32 %v1357_v32  ;;  %vm130_vm2 = vweird.f32 %v2083_v25 }
  0x87   :  { %v2124_v23 = vpop.eup %1360  ;;  %1368 = vpow2.f32 %v1297_v21  ;;  %vm2152_vm3 = vcmp.eq.f32.partialorder %v134_v33, 8.507059e+37  ;;  %v2156_v49 = vor.u32 1.1754944e-38, %v136_v29  ;;  %v287_v52 = vmin.f32 %v2115_v47, 1000.0  ;;  %vm2162_vm4 = vmor %vm85_vm10, %vm86_vm15 }
  0x88   :  { %v82_v0 = vsub.f32 1.0, %v81_v9  ;;  %v2137_v61 = vpop.eup %1362  ;;  %v96_v8 = vmul.f32 %v2124_v23, %v2075_v20  ;;  %vm101_vm5 = vweird.f32 %v2124_v23  ;;  %1370 = vpow2.f32 %v268_v43 }
  0x89   :  { %v111_v51 = vmul.f32 %v2137_v61, %v2077_v14  ;;  %vm116_vm6 = vweird.f32 %v2137_v61  ;;  %vm2198_vm0 = vmor %vm100_vm12, %vm101_vm5  ;;  %v270_v21 = vmul.f32 1.442695, %v2092_v4  ;;  %1372 = vpow2.f32 %v1298_v58 }
  0x8a   :  { %v83_v26 = vmul.f32 %v1357_v32, %v82_v0  ;;  %v97_v54 = vsub.f32 1.0, %v96_v8  ;;  %vm2213_vm9 = vmor %vm115_vm14, %vm116_vm6  ;;  %1374 = vpow2.f32 %v1299_v24 }
  0x8b   :  { %v2148_v37 = vpop.eup %1364  ;;  %v112_v6 = vsub.f32 1.0, %v111_v51 }
  0x8c   :  { %v126_v55 = vmul.f32 %v2148_v37, %v2083_v25  ;;  %v84_v13 = vadd.f32 %v1357_v32, %v83_v26  ;;  %v1367_v39 = vpop.eup %1366  ;;  %v98_v15 = vmul.f32 %v2124_v23, %v97_v54  ;;  %vm131_vm10 = vweird.f32 %v2148_v37  ;;  %v2244_v26 = vld [vmem:[%s2679_s1 + $0x8] sm:$0x1f] }
  0x8d   :  { %v113_v5 = vmul.f32 %v2137_v61, %v112_v6  ;;  %v2203_v40 = vadd.f32 1.0, %v1367_v39 }
  0x8e   :  { %v127_v18 = vsub.f32 1.0, %v126_v55  ;;  %v88_v3 = vsel %vm2162_vm4, %v1357_v32, %v84_v13  ;;  %v1369_v32 = vpop.eup %1368  ;;  %v99_v33 = vadd.f32 %v2124_v23, %v98_v15 }
  0x8f   :  { %v93_v9 = vsel %vm2102_vm11, %v92_v36, %v88_v3  ;;  %v114_v14 = vadd.f32 %v2137_v61, %v113_v5  ;;  %vm2232_vm11 = vmor %vm130_vm2, %vm131_vm10  ;;  %1376 = vrcp.f32 %v2203_v40  ;;  %v2259_v58 = vadd.f32 1.0, %v1369_v32  ;;  %v2261_v13 = vpop.eup %1370  ;;  %v2307_v5 = vld [vmem:[%s2675_s0 + $0xc8] sm:$0x1f] }
  0x90   :  { %v128_v29 = vmul.f32 %v2148_v37, %v127_v18  ;;  %v303_v4 = vsel %vm2176_vm7, %v284_v12, %v93_v9  ;;  %v103_v43 = vsel %vm2198_vm0, %v2124_v23, %v99_v33  ;;  %v2257_v23 = vld [vmem:[%s2679_s1 + $0x10] sm:$0x1f]  ;;  %1378 = vpow2.f32 %v270_v21 }
  0x91   :  { %v321_v12 = vmul.f32 %v2192_v63, %v303_v4  ;;  %v108_v30 = vsel %vm2117_vm13, %v2121_v34, %v103_v43  ;;  %v118_v54 = vsel %vm2213_vm9, %v2137_v61, %v114_v14  ;;  %v2273_v61 = vld [vmem:[%s2680_s2 + $0x8] sm:$0x1f]  ;;  %vm145_vm12 = vweird.f32 %v2203_v40 }
  0x92   :  { %v129_v25 = vadd.f32 %v2148_v37, %v128_v29  ;;  %v304_v34 = vsel %vm2176_vm7, %v285_v38, %v108_v30  ;;  %v123_v24 = vsel %vm2126_vm1, %v2141_v22, %v118_v54  ;;  %v2296_v22 = vld [vmem:[%s2679_s1 + $0x18] sm:$0x1f]  ;;  %1380 = vpow2.f32 %v1300_v57 }
  0x93   :  { %v339_v42 = vadd.f32 %v2225_v19, %v321_v12  ;;  %v322_v11 = vmul.f32 %v2244_v26, %v304_v34  ;;  %v305_v38 = vsel %vm2176_vm7, %v286_v7, %v123_v24  ;;  %v2330_v12 = vmul.f32 -1.442695, %v2307_v5 }
  0x94   :  { %v133_v39 = vsel %vm2232_vm11, %v2148_v37, %v129_v25  ;;  %v1373_v37 = vpop.eup %1372  ;;  %v323_v3 = vmul.f32 %v2257_v23, %v305_v38  ;;  %v149_v30 = vand.u32 2147483647, %v2203_v40  ;;  %v151_v54 = vand.u32 2147483648, %v2203_v40 }
  0x95   :  { %v138_v50 = vsel %vm2152_vm3, %v2156_v49, %v133_v39  ;;  %v1375_v21 = vpop.eup %1374  ;;  %v340_v9 = vadd.f32 %v2273_v61, %v322_v11  ;;  %1382 = vrcp.f32 %v2259_v58  ;;  %v2369_v11 = vadd.f32 1.0, %v1373_v37 }
  0x96   :  { %v306_v20 = vsel %vm2176_vm7, %v287_v52, %v138_v50  ;;  %v2319_v49 = vpop.eup %1376  ;;  %v341_v29 = vadd.f32 %v2291_v60, %v323_v3  ;;  %vm2378_vm14 = vcmp.eq.f32.partialorder %v149_v30, 8.507059e+37  ;;  %v2383_v50 = vadd.f32 1.0, %v1375_v21 }
  0x97   :  { %v141_v25 = vmul.f32 %v2319_v49, %v2203_v40  ;;  %vm146_vm13 = vweird.f32 %v2319_v49  ;;  %1384 = vrcp.f32 %v2369_v11  ;;  %vm160_vm1 = vweird.f32 %v2259_v58 }
  0x98   :  { %vm2390_vm15 = vmor %vm145_vm12, %vm146_vm13  ;;  %v179_v21 = vand.u32 2147483647, %v2369_v11  ;;  %1386 = vrcp.f32 %v2383_v50  ;;  %vm175_vm3 = vweird.f32 %v2369_v11  ;;  %vm190_vm6 = vweird.f32 %v2383_v50 }
  0x99   :  { %v142_v39 = vsub.f32 1.0, %v141_v25 }
  0x9a   :  { %vm2444_vm5 = vcmp.eq.f32.partialorder %v179_v21, 8.507059e+37  ;;  %v2491_v21 = vld [vmem:[%s2679_s1 + $0x28] sm:$0x1f] }
  0x9b   :  { %v143_v38 = vmul.f32 %v2319_v49, %v142_v39 }
  0x9d   :  { %v144_v40 = vadd.f32 %v2319_v49, %v143_v38 }
  0xb4   :  { %v899_v0 = vpop.f32.mrf.mxu2 }
  0xb5   :  { %v919_v55 = vpop.f32.mrf.mxu3 }
  0xbc   :  { %v839_v36 = vpop.f32.mrf.mxu0 }
  0xbf   :  { %v859_v51 = vpop.f32.mrf.mxu1 }
  0xc3   :  { %v2263_v6 = vpop.permute.xlu0 %1164 }
  0xc4   :  { %v1167_v15 = vadd.f32 %v2263_v6, %v839_v36  ;;  %v1168_v18 = vadd.f32 %v2263_v6, %v859_v51  ;;  %v1169_v53 = vadd.f32 %v2263_v6, %v899_v0  ;;  %v1170_v7 = vadd.f32 %v2263_v6, %v919_v55  ;;  %v2323_v0 = vpop.eup %1378 }
  0xc5   :  { %v324_v36 = vmul.f32 %v2296_v22, %v306_v20 }
  0xc6   :  { %v1191_v32 = vrot.slane %v1167_v15, 3  ;;  %v1192_v33 = vrot.slane %v1168_v18, 3  ;;  %v1193_v4 = vrot.slane %v1169_v53, 3  ;;  %v1194_v14 = vrot.slane %v1170_v7, 3  ;;  %v1381_v7 = vpop.eup %1380 }
  0xc7   :  { %v342_v51 = vadd.f32 %v2317_v62, %v324_v36  ;;  %v164_v15 = vand.u32 2147483647, %v2259_v58  ;;  %v288_v53 = vmin.f32 %v2261_v13, 1000.0  ;;  %v272_v13 = vmul.f32 1.442695, %v2135_v31  ;;  %v1383_v20 = vpop.eup %1382 }
  0xc8   :  { %v1216_v47 = vsel %vm1215_vm8, %v339_v42, %v1191_v32  ;;  %v1228_v52 = vsel %vm1215_vm8, %v1191_v32, %v1811_v17  ;;  %v1217_v8 = vsel %vm1215_vm8, %v340_v9, %v1192_v33  ;;  %v1229_v43 = vsel %vm1215_vm8, %v1192_v33, %v1841_v45  ;;  %v1019_v45 = vpop.f32.mrf.mxu2 }
  0xc9   :  { %1240 = vst [vmem:[%s2676_s5] sm:$0xff] %v1216_v47  ;;  %v1218_v17 = vsel %vm1215_vm8, %v341_v29, %v1193_v4  ;;  %v1230_v57 = vsel %vm1215_vm8, %v1193_v4, %v1692_v41  ;;  %v1231_v42 = vsel %vm1215_vm8, %v1194_v14, %v1704_v1  ;;  %v1219_v24 = vsel %vm1215_vm8, %v342_v51, %v1194_v14  ;;  %v2422_v14 = vld [vmem:[%s2679_s1 + $0x20] sm:$0x1f] }
  0xca   :  { %1242 = vst [vmem:[%s2676_s5 + $0x10] sm:$0xff] %v1228_v52  ;;  %v166_v1 = vand.u32 2147483648, %v2259_v58  ;;  %v2372_v18 = vadd.f32 %v2263_v6, %v1019_v45  ;;  %v152_v32 = vor.u32 1.1754944e-38, %v151_v54  ;;  %vm2410_vm2 = vcmp.eq.f32.partialorder %v164_v15, 8.507059e+37 }
  0xcb   :  { %1241 = vst [vmem:[%s2676_s5 + $0x8] sm:$0xff] %v1217_v8  ;;  %v289_v29 = vmin.f32 %v2323_v0, 1000.0  ;;  %v148_v36 = vsel %vm2390_vm15, %v2319_v49, %v144_v40  ;;  %v156_v47 = vmul.f32 %v1383_v20, %v2259_v58  ;;  %v1039_v0 = vpop.f32.mrf.mxu3  ;;  %1388 = vpow2.f32 %v272_v13 }
  0xcc   :  { %1243 = vst [vmem:[%s2676_s5 + $0x18] sm:$0xff] %v1229_v43  ;;  %v1197_v33 = vrot.slane %v2372_v18, 3  ;;  %v167_v31 = vor.u32 1.1754944e-38, %v166_v1  ;;  %v153_v8 = vsel %vm2378_vm14, %v152_v32, %v148_v36  ;;  %v181_v43 = vand.u32 2147483648, %v2369_v11 }
  0xcd   :  { %1248 = vst [vmem:[%s2676_s5 + $0x40] sm:$0xff] %v1218_v17  ;;  %v307_v51 = vsel %vm2176_vm7, %v288_v53, %v153_v8  ;;  %v2441_v17 = vld [vmem:[%s2680_s2 + $0x20] sm:$0x1f]  ;;  %v157_v25 = vsub.f32 1.0, %v156_v47  ;;  %vm161_vm4 = vweird.f32 %v1383_v20  ;;  %v274_v45 = vmul.f32 1.442695, %v2146_v48 }
  0xce   :  { %1250 = vst [vmem:[%s2676_s5 + $0x50] sm:$0xff] %v1230_v57  ;;  %v1234_v49 = vsel %vm1215_vm8, %v1197_v33, %v1756_v44  ;;  %v1385_v44 = vpop.eup %1384  ;;  %v2454_v57 = vadd.f32 %v2263_v6, %v1039_v0  ;;  %vm2468_vm10 = vmor %vm160_vm1, %vm161_vm4  ;;  %v182_v3 = vor.u32 1.1754944e-38, %v181_v43  ;;  %v276_v0 = vmul.f32 1.442695, %v2185_v59  ;;  %v31_v48 = vld [vmem:[%s2675_s0 + $0xf8] sm:$0x1f] }
  0xcf   :  { %v959_v55 = vpop.f32.mrf.mxu0  ;;  %1249 = vst [vmem:[%s2676_s5 + $0x48] sm:$0xff] %v1219_v24  ;;  %v158_v24 = vmul.f32 %v1383_v20, %v157_v25  ;;  %v171_v15 = vmul.f32 %v1385_v44, %v2369_v11  ;;  %v1387_v1 = vpop.eup %1386  ;;  %1390 = vpow2.f32 %v274_v45  ;;  %vm176_vm0 = vweird.f32 %v1385_v44  ;;  %v2515_v11 = vld [vmem:[%s2680_s2 + $0x28] sm:$0x1f] }
  0xd0   :  { %v2355_v34 = vadd.f32 %v2263_v6, %v959_v55  ;;  %1251 = vst [vmem:[%s2676_s5 + $0x58] sm:$0xff] %v1231_v42  ;;  %v325_v55 = vmul.f32 %v2422_v14, %v307_v51  ;;  %v2456_v42 = vadd.f32 1.0, %v1381_v7  ;;  %v186_v37 = vmul.f32 %v1387_v1, %v2383_v50  ;;  %vm2497_vm11 = vmor %vm175_vm3, %vm176_vm0 }
  0xd1   :  { %1266 = vst [vmem:[%s2676_s5 + $0xd0] sm:$0xff] %v1234_v49  ;;  %v159_v53 = vadd.f32 %v1383_v20, %v158_v24  ;;  %v172_v7 = vsub.f32 1.0, %v171_v15  ;;  %v1389_v32 = vpop.eup %1388  ;;  %v1198_v13 = vrot.slane %v2454_v57, 3  ;;  %vm191_vm9 = vweird.f32 %v1387_v1 }
  0xd2   :  { %v1195_v41 = vrot.slane %v2355_v34, 3  ;;  %v343_v38 = vadd.f32 %v2441_v17, %v325_v55  ;;  %1392 = vrcp.f32 %v2456_v42  ;;  %v290_v8 = vmin.f32 %v1389_v32, 1000.0  ;;  %vm2527_vm13 = vmor %vm190_vm6, %vm191_vm9 }
  0xd3   :  { %v163_v40 = vsel %vm2468_vm10, %v1383_v20, %v159_v53  ;;  %v173_v34 = vmul.f32 %v1385_v44, %v172_v7  ;;  %v1235_v20 = vsel %vm1215_vm8, %v1198_v13, %v1778_v35  ;;  %v30_v35 = vld [vmem:[%s2675_s0 + $0xf0] sm:$0x1f]  ;;  %vm205_vm14 = vweird.f32 %v2456_v42 }
  0xd4   :  { %v1232_v9 = vsel %vm1215_vm8, %v1195_v41, %v1946_v46  ;;  %v1220_v58 = vsel %vm1215_vm8, %v343_v38, %v1195_v41  ;;  %v187_v41 = vsub.f32 1.0, %v186_v37  ;;  %1267 = vst [vmem:[%s2676_s5 + $0xd8] sm:$0xff] %v1235_v20  ;;  %1394 = vpow2.f32 %v276_v0 }
  0xd5   :  { %1258 = vst [vmem:[%s2676_s5 + $0x90] sm:$0xff] %v1232_v9  ;;  %v196_v9 = vand.u32 2147483648, %v2383_v50  ;;  %v1391_v59 = vpop.eup %1390  ;;  %1396 = vpow2.f32 %v2330_v12  ;;  %v209_v15 = vand.u32 2147483647, %v2456_v42  ;;  %v1302_v38 = vmul.f32 -1.442695, %v30_v35 }
  0xd6   :  { %v979_v4 = vpop.f32.mrf.mxu1  ;;  %1256 = vst [vmem:[%s2676_s5 + $0x80] sm:$0xff] %v1220_v58  ;;  %v188_v43 = vmul.f32 %v1387_v1, %v187_v41  ;;  %v291_v45 = vmin.f32 %v1391_v59, 1000.0  ;;  %v211_v53 = vand.u32 2147483648, %v2456_v42  ;;  %v1303_v32 = vmul.f32 -1.442695, %v31_v48 }
  0xd7   :  { %v2426_v52 = vadd.f32 %v2263_v6, %v979_v4  ;;  %v168_v4 = vsel %vm2410_vm2, %v167_v31, %v163_v40  ;;  %v174_v31 = vadd.f32 %v1385_v44, %v173_v34  ;;  %v197_v51 = vor.u32 1.1754944e-38, %v196_v9 }
  0xd8   :  { %v308_v46 = vsel %vm2176_vm7, %v289_v29, %v168_v4  ;;  %v189_v55 = vadd.f32 %v1387_v1, %v188_v43  ;;  %v1393_v24 = vpop.eup %1392  ;;  %1398 = vpow2.f32 %v1302_v38  ;;  %v212_v40 = vor.u32 1.1754944e-38, %v211_v53 }
  0xd9   :  { %v1196_v30 = vrot.slane %v2426_v52, 3  ;;  %v326_v49 = vmul.f32 %v2491_v21, %v308_v46  ;;  %v178_v25 = vsel %vm2497_vm11, %v1385_v44, %v174_v31  ;;  %v201_v12 = vmul.f32 %v1393_v24, %v2456_v42 }
  0xda   :  { %vm206_vm15 = vweird.f32 %v1393_v24  ;;  %v1395_v58 = vpop.eup %1394  ;;  %v278_v34 = vmul.f32 1.442695, %v2307_v5  ;;  %1400 = vpow2.f32 %v1303_v32  ;;  %vm210_vm2 = vcmp.eq.f32.partialorder %v209_v15, 8.507059e+37 }
  0xdb   :  { %v1233_v39 = vsel %vm1215_vm8, %v1196_v30, %v1965_v16  ;;  %v194_v16 = vand.u32 2147483647, %v2383_v50  ;;  %v183_v50 = vsel %vm2444_vm5, %v182_v3, %v178_v25  ;;  %v202_v37 = vsub.f32 1.0, %v201_v12  ;;  %vm2568_vm1 = vmor %vm205_vm14, %vm206_vm15 }
  0xdc   :  { %1259 = vst [vmem:[%s2676_s5 + $0x98] sm:$0xff] %v1233_v39  ;;  %v344_v39 = vadd.f32 %v2515_v11, %v326_v49  ;;  %v309_v44 = vsel %vm2176_vm7, %v290_v8, %v183_v50  ;;  %v292_v5 = vmin.f32 %v1395_v58, 1000.0  ;;  %v282_v29 = vmul.f32 1.442695, %v31_v48 }
  0xdd   :  { %vm2501_vm12 = vcmp.eq.f32.partialorder %v194_v16, 8.507059e+37  ;;  %v193_v16 = vsel %vm2527_vm13, %v1387_v1, %v189_v55  ;;  %v327_v3 = vmul.f32 %v2192_v63, %v309_v44  ;;  %v1397_v63 = vpop.eup %1396  ;;  %v203_v9 = vmul.f32 %v1393_v24, %v202_v37 }
  0xde   :  { %v1221_v54 = vsel %vm1215_vm8, %v344_v39, %v1196_v30  ;;  %v198_v7 = vsel %vm2501_vm12, %v197_v51, %v193_v16  ;;  %v1399_v18 = vpop.eup %1398 }
  0xdf   :  { %1257 = vst [vmem:[%s2676_s5 + $0x88] sm:$0xff] %v1221_v54  ;;  %v310_v1 = vsel %vm2176_vm7, %v291_v45, %v198_v7  ;;  %v345_v52 = vadd.f32 %v2225_v19, %v327_v3  ;;  %v77_v19 = vadd.f32 1.0, %v1397_v63  ;;  %v78_v47 = vadd.f32 1.0, %v1399_v18 }
  0xe0   :  { %v328_v30 = vmul.f32 %v2244_v26, %v310_v1  ;;  %v204_v26 = vadd.f32 %v1393_v24, %v203_v9  ;;  %v1401_v57 = vpop.eup %1400 }
  0xe1   :  { %v1222_v41 = vsel %vm1215_vm8, %v345_v52, %v1197_v33  ;;  %1402 = vrcp.f32 %v77_v19  ;;  %v280_v33 = vmul.f32 1.442695, %v30_v35  ;;  %v2590_v35 = vadd.f32 1.0, %v1401_v57 }
  0xe2   :  { %v346_v4 = vadd.f32 %v2273_v61, %v328_v30  ;;  %1264 = vst [vmem:[%s2676_s5 + $0xc0] sm:$0xff] %v1222_v41  ;;  %v208_v42 = vsel %vm2568_vm1, %v1393_v24, %v204_v26  ;;  %1404 = vpow2.f32 %v278_v34  ;;  %v226_v45 = vand.u32 2147483648, %v77_v19 }
  0xe3   :  { %v213_v20 = vsel %vm210_vm2, %v212_v40, %v208_v42  ;;  %1406 = vrcp.f32 %v78_v47  ;;  %vm220_vm3 = vweird.f32 %v77_v19  ;;  %v239_v53 = vand.u32 2147483647, %v78_v47 }
  0xe4   :  { %v1223_v61 = vsel %vm1215_vm8, %v346_v4, %v1198_v13  ;;  %v311_v46 = vsel %vm2176_vm7, %v292_v5, %v213_v20  ;;  %1408 = vpow2.f32 %v280_v33  ;;  %v241_v54 = vand.u32 2147483648, %v78_v47 }
  0xe5   :  { %1265 = vst [vmem:[%s2676_s5 + $0xc8] sm:$0xff] %v1223_v61  ;;  %v329_v13 = vmul.f32 %v2257_v23, %v311_v46  ;;  %v224_v23 = vand.u32 2147483647, %v77_v19  ;;  %1410 = vrcp.f32 %v2590_v35  ;;  %v227_v3 = vor.u32 1.1754944e-38, %v226_v45 }
  0xe6   :  { %1412 = vpow2.f32 %v282_v29  ;;  %vm235_vm6 = vweird.f32 %v78_v47  ;;  %vm2619_vm9 = vcmp.eq.f32.partialorder %v239_v53, 8.507059e+37  ;;  %v242_v41 = vor.u32 1.1754944e-38, %v241_v54 }
  0xe7   :  { %v1403_v59 = vpop.eup %1402  ;;  %v347_v49 = vadd.f32 %v2291_v60, %v329_v13  ;;  %vm225_vm0 = vcmp.eq.f32.partialorder %v224_v23, 8.507059e+37  ;;  %vm250_vm12 = vweird.f32 %v2590_v35  ;;  %v256_v61 = vand.u32 2147483648, %v2590_v35 }
  0xe8   :  { %v1405_v51 = vpop.eup %1404  ;;  %v216_v55 = vmul.f32 %v1403_v59, %v77_v19  ;;  %vm221_vm4 = vweird.f32 %v1403_v59 }
  0xe9   :  { %v1407_v50 = vpop.eup %1406  ;;  %v293_v16 = vmin.f32 %v1405_v51, 1000.0  ;;  %vm2611_vm5 = vmor %vm220_vm3, %vm221_vm4 }
  0xea   :  { %v217_v60 = vsub.f32 1.0, %v216_v55  ;;  %v1409_v44 = vpop.eup %1408  ;;  %v231_v12 = vmul.f32 %v1407_v50, %v78_v47  ;;  %vm236_vm10 = vweird.f32 %v1407_v50  ;;  %v254_v47 = vand.u32 2147483647, %v2590_v35 }
  0xeb   :  { %v294_v52 = vmin.f32 %v1409_v44, 1000.0  ;;  %v1411_v63 = vpop.eup %1410  ;;  %vm2625_vm11 = vmor %vm235_vm6, %vm236_vm10 }
  0xec   :  { %v232_v32 = vsub.f32 1.0, %v231_v12  ;;  %v246_v36 = vmul.f32 %v1411_v63, %v2590_v35  ;;  %v1413_v33 = vpop.eup %1412  ;;  %vm251_vm13 = vweird.f32 %v1411_v63  ;;  %vm255_vm15 = vcmp.eq.f32.partialorder %v254_v47, 8.507059e+37 }
  0xed   :  { %vm252_vm14 = vmor %vm250_vm12, %vm251_vm13 }
  0xee   :  { %v1139_v0 = vpop.f32.mrf.mxu2  ;;  %v233_v40 = vmul.f32 %v1407_v50, %v232_v32 }
  0xef   :  { %v2588_v43 = vadd.f32 %v2263_v6, %v1139_v0 }
  0xf0   :  { %v1079_v31 = vpop.f32.mrf.mxu0  ;;  %v234_v18 = vadd.f32 %v1407_v50, %v233_v40 }
  0xf1   :  { %v1175_v8 = vadd.f32 %v2263_v6, %v1079_v31  ;;  %v1201_v24 = vrot.slane %v2588_v43, 3  ;;  %v257_v31 = vor.u32 1.1754944e-38, %v256_v61 }
  0xf2   :  { %v1159_v39 = vpop.f32.mrf.mxu3  ;;  %v238_v20 = vsel %vm2625_vm11, %v1407_v50, %v234_v18 }
  0xf3   :  { %v1199_v25 = vrot.slane %v1175_v8, 3  ;;  %v1238_v48 = vsel %vm1215_vm8, %v1201_v24, %v1989_v56  ;;  %v1178_v1 = vadd.f32 %v2263_v6, %v1159_v39  ;;  %v243_v0 = vsel %vm2619_vm9, %v242_v41, %v238_v20 }
  0xf4   :  { %1282 = vst [vmem:[%s2676_s5 + $0x150] sm:$0xff] %v1238_v48  ;;  %v313_v13 = vsel %vm2176_vm7, %v294_v52, %v243_v0 }
  0xf5   :  { %v1224_v15 = vsel %vm1215_vm8, %v347_v49, %v1199_v25  ;;  %v1236_v38 = vsel %vm1215_vm8, %v1199_v25, %v2019_v28  ;;  %v218_v28 = vmul.f32 %v1403_v59, %v217_v60  ;;  %v1202_v30 = vrot.slane %v1178_v1, 3 }
  0xf6   :  { %1272 = vst [vmem:[%s2676_s5 + $0x100] sm:$0xff] %v1224_v15  ;;  %v1099_v7 = vpop.f32.mrf.mxu1  ;;  %v331_v8 = vmul.f32 %v2422_v14, %v313_v13 }
  0xf7   :  { %1274 = vst [vmem:[%s2676_s5 + $0x110] sm:$0xff] %v1236_v38  ;;  %v1176_v37 = vadd.f32 %v2263_v6, %v1099_v7  ;;  %v219_v58 = vadd.f32 %v1403_v59, %v218_v28  ;;  %v1239_v19 = vsel %vm1215_vm8, %v1202_v30, %v2004_v27  ;;  %v247_v27 = vsub.f32 1.0, %v246_v36 }
  0xf8   :  { %1283 = vst [vmem:[%s2676_s5 + $0x158] sm:$0xff] %v1239_v19 }
  0xf9   :  { %v1200_v9 = vrot.slane %v1176_v37, 3  ;;  %v223_v6 = vsel %vm2611_vm5, %v1403_v59, %v219_v58  ;;  %v248_v46 = vmul.f32 %v1411_v63, %v247_v27 }
  0xfa   :  { %v228_v26 = vsel %vm225_vm0, %v227_v3, %v223_v6 }
  0xfb   :  { %v1237_v5 = vsel %vm1215_vm8, %v1200_v9, %v2040_v2  ;;  %v312_v42 = vsel %vm2176_vm7, %v293_v16, %v228_v26  ;;  %v249_v59 = vadd.f32 %v1411_v63, %v248_v46 }
  0xfc   :  { %1275 = vst [vmem:[%s2676_s5 + $0x118] sm:$0xff] %v1237_v5  ;;  %v330_v2 = vmul.f32 %v2296_v22, %v312_v42  ;;  %v295_v22 = vmin.f32 %v1413_v33, 1000.0 }
  0xfd   :  { %v253_v29 = vsel %vm252_vm14, %v1411_v63, %v249_v59 }
  0xfe   :  { %v348_v57 = vadd.f32 %v2317_v62, %v330_v2  ;;  %v349_v62 = vadd.f32 %v2441_v17, %v331_v8  ;;  %v258_v51 = vsel %vm255_vm15, %v257_v31, %v253_v29 }
  0xff   :  { %v314_v14 = vsel %vm2176_vm7, %v295_v22, %v258_v51 }
 0x100   :  { %v1225_v49 = vsel %vm1215_vm8, %v348_v57, %v1200_v9  ;;  %v1226_v35 = vsel %vm1215_vm8, %v349_v62, %v1201_v24  ;;  %v332_v25 = vmul.f32 %v2491_v21, %v314_v14 }
 0x101   :  { %1273 = vst [vmem:[%s2676_s5 + $0x108] sm:$0xff] %v1225_v49 }
 0x102   :  { %1280 = vst [vmem:[%s2676_s5 + $0x140] sm:$0xff] %v1226_v35  ;;  %v350_v55 = vadd.f32 %v2515_v11, %v332_v25 }
 0x104   :  { %v1227_v45 = vsel %vm1215_vm8, %v350_v55, %v1202_v30 }
 0x105   :  { %1281 = vst [vmem:[%s2676_s5 + $0x148] sm:$0xff] %v1227_v45 }

</bundles_post_ra>
